<compile_context>
chip_gen: v7x
topology: tpu7x:2x2x1
jax: 0.10.0
libtpu: 0.0.40
codegen_flags: <defaults>
</compile_context>

<pallas_src>
import jax
import jax.numpy as jnp
from jax import lax
from jax.experimental import pallas as pl
from jax.experimental.pallas import tpu as pltpu


def _round_up(x, m):
    return ((x + m - 1) // m) * m


# ---------------------------------------------------------------------------
# Fused kernel: conv1 + conv2 + 3-layer MLP head, BM examples per grid step
# ---------------------------------------------------------------------------
def _critic_kernel(p_ref, a_ref, w1big_ref, wc2_ref, wl1a_ref, wl1b_ref,
                   wl2_ref, vec_ref, q_ref):
    f32 = jnp.float32
    bf16 = jnp.bfloat16
    n2 = p_ref.shape[0]            # conv2 output positions (2*2 = 4)
    c1big = w1big_ref.shape[1]     # 9*32 conv1 channels (+ pad) = 384
    c2 = wc2_ref.shape[1]          # conv2 out channels = 32
    hid = wl2_ref.shape[1]         # hidden size = 128

    # Hoist bias loads/broadcast sources out of the unrolled loop.
    b1 = vec_ref[0:1, 0:c1big]
    b2 = vec_ref[1:2, 0:c2]

    # linear1: action contribution + bias (tiny K, full M).
    acts = a_ref[...].astype(bf16)                                     # (BM, A)
    h3 = (jnp.dot(acts, wl1b_ref[...], preferred_element_type=f32)
          + vec_ref[2:3, 0:hid])                                       # (BM, hid)

    # conv1 -> conv2 -> linear1(conv part), one conv2 window position at a time.
    # Every dot has M = BM rows; weights are bf16, accumulation in f32.
    for r in range(n2):
        pr = p_ref[r]                                                  # (BM, K) bf16
        # conv1 over the 9 conv1-positions of window r (block-diag weight) + ReLU
        h1 = jnp.dot(pr, w1big_ref[...], preferred_element_type=f32)   # (BM, 384)
        h1 = jnp.maximum(h1 + b1, 0.0)
        # conv2 + ReLU -> 32 channels at window position r
        h2 = jnp.dot(h1.astype(bf16), wc2_ref[...],
                     preferred_element_type=f32)                       # (BM, 32)
        h2 = jnp.maximum(h2 + b2, 0.0)
        # linear1 rows for this (hw, channel) block (torch NCHW flatten folded
        # into wl1a's row order -> no in-kernel reshape/concat)
        h3 = h3 + jnp.dot(h2.astype(bf16), wl1a_ref[r * c2:(r + 1) * c2, :],
                          preferred_element_type=f32)
    h3 = jnp.maximum(h3, 0.0)                                          # (BM, hid)

    # linear2 + ReLU
    h4 = jnp.dot(h3.astype(bf16), wl2_ref[...],
                 preferred_element_type=f32) + vec_ref[3:4, 0:hid]
    h4 = jnp.maximum(h4, 0.0)

    # linear3 (out dim 1): VPU multiply + lane reduction, no N=1 MXU matmul.
    q = jnp.sum(h4 * vec_ref[4:5, 0:hid], axis=-1, keepdims=True) + vec_ref[5:6, 0:1]
    # lane-dense output store; the wrapper slices [:, :1].
    q_ref[...] = jnp.broadcast_to(q, q_ref.shape)


def _rep_spec(shape):
    """BlockSpec for a grid-invariant (replicated) whole-array operand."""
    nd = len(shape)
    return pl.BlockSpec(shape, lambda b: (0,) * nd)


# ---------------------------------------------------------------------------
# Wrapper-side data movement (im2col) — 9 strided slices per level, no compute
# ---------------------------------------------------------------------------
def _extract_patches(x, k, s):
    """[B,H,W,C] -> [B,oh,ow,k*k*C], VALID padding, feature order (kh, kw, c)."""
    B, H, W, C = x.shape
    oh = (H - k) // s + 1
    ow = (W - k) // s + 1
    rows = []
    for di in range(k):
        cols = [x[:, di:di + (oh - 1) * s + 1:s, dj:dj + (ow - 1) * s + 1:s, :]
                for dj in range(k)]
        rows.append(jnp.stack(cols, axis=3))           # [B, oh, ow, k, C]
    pat = jnp.stack(rows, axis=3)                       # [B, oh, ow, k, k, C]
    return pat.reshape(B, oh, ow, k * k * C)


def centralised_critic_forward(kparams, view_state, agent_actions, *, bm=128):
    """Matches centralised_critic.forward(view_state, agent_actions) -> [B, 1].

    bm: examples per grid step. 128 matches the v5e MXU; use 256 on v6e/v7x
    (keep >= 2 grid steps per TensorCore on v7x so both cores stay busy).
    """
    B = view_state.shape[0]
    # Two-level im2col: conv1 patches, then conv2 windows over those patches.
    p1 = _extract_patches(view_state.astype(jnp.float32), k=3, s=2)    # [B,6,6,45]
    p2 = _extract_patches(p1, k=3, s=2)                                # [B,2,2,405]
    n2 = p2.shape[1] * p2.shape[2]
    p2 = p2.reshape(B, n2, p2.shape[-1])
    kdim = kparams["w1big"].shape[0]                                   # 512 (aligned K)
    p2 = jnp.pad(p2, ((0, 0), (0, 0), (0, kdim - p2.shape[-1])))       # lane-pad K
    p2 = p2.astype(jnp.bfloat16)                                       # halve patch DMA
    acts = agent_actions.astype(jnp.float32)                           # [B, A]
    adim = acts.shape[-1]

    # Batch tiling: pad B up to a multiple of BM (BM always a multiple of 8).
    BM = min(bm, _round_up(B, 8))
    Bp = _round_up(B, BM)
    if Bp != B:
        p2 = jnp.pad(p2, ((0, Bp - B), (0, 0), (0, 0)))
        acts = jnp.pad(acts, ((0, Bp - B), (0, 0)))
    # hw-major layout (n2, Bp, K): each window position is a contiguous,
    # well-tiled (BM, K) slab inside the kernel (no in-kernel relayout).
    p2 = jnp.transpose(p2, (1, 0, 2))

    out = pl.pallas_call(
        _critic_kernel,
        out_shape=jax.ShapeDtypeStruct((Bp, 128), jnp.float32),
        grid=(Bp // BM,),
        in_specs=[
            pl.BlockSpec((n2, BM, kdim), lambda b: (0, b, 0)),          # patches
            pl.BlockSpec((BM, adim), lambda b: (b, 0)),                 # actions
            _rep_spec(kparams["w1big"].shape),
            _rep_spec(kparams["wc2"].shape),
            _rep_spec(kparams["wl1a"].shape),
            _rep_spec(kparams["wl1b"].shape),
            _rep_spec(kparams["wl2"].shape),
            _rep_spec(kparams["vecs"].shape),
        ],
        out_specs=pl.BlockSpec((BM, 128), lambda b: (b, 0)),
        compiler_params=pltpu.CompilerParams(
            dimension_semantics=("parallel",)),   # v7x: batch tiles over both TCs
    )(p2, acts, kparams["w1big"], kparams["wc2"], kparams["wl1a"],
      kparams["wl1b"], kparams["wl2"], kparams["vecs"])
    return out[:B, :1]


# ---------------------------------------------------------------------------
# Parameters: PyTorch-layout init + one-time re-layout to the kernel layout
# ---------------------------------------------------------------------------
def _kaiming_uniform(key, shape, fan_in):
    # torch.nn.init.kaiming_uniform_ defaults (a=0 -> gain=sqrt(2)), as used by
    # weights_init_kaiming; biases there are set to 0.
    bound = jnp.sqrt(2.0) * jnp.sqrt(3.0 / fan_in)
    return jax.random.uniform(key, shape, jnp.float32, -bound, bound)


def init_torch_params(key, num_agents, action_size, input_size=128, hidden_size=128):
    ks = jax.random.split(key, 5)
    din = input_size + int(num_agents * action_size)
    return {
        "conv1_w": _kaiming_uniform(ks[0], (32, 5, 3, 3), 5 * 3 * 3),
        "conv1_b": jnp.zeros((32,), jnp.float32),
        "conv2_w": _kaiming_uniform(ks[1], (32, 32, 3, 3), 32 * 3 * 3),
        "conv2_b": jnp.zeros((32,), jnp.float32),
        "l1_w": _kaiming_uniform(ks[2], (hidden_size, din), din),
        "l1_b": jnp.zeros((hidden_size,), jnp.float32),
        "l2_w": _kaiming_uniform(ks[3], (hidden_size, hidden_size), hidden_size),
        "l2_b": jnp.zeros((hidden_size,), jnp.float32),
        "l3_w": _kaiming_uniform(ks[4], (1, hidden_size), hidden_size),
        "l3_b": jnp.zeros((1,), jnp.float32),
    }


def prepare_kernel_params(tp, action_dim):
    """Re-layout PyTorch-style parameters into the fused-kernel layout (one-time).

    Matmul weights are stored bf16 (MXU-native on v6e/v7x, halves weight VMEM/DMA);
    biases and the linear3 row stay f32.
    """
    in_ch = tp["conv1_w"].shape[1]                       # 5
    c1 = tp["conv1_w"].shape[0]                          # 32
    c2 = tp["conv2_w"].shape[0]                          # 32
    k = tp["conv1_w"].shape[-1]                          # 3
    kk = k * k                                           # 9
    pf = kk * in_ch                                      # 45  (conv1 im2col K)
    k1, h1 = kk * pf, kk * c1                            # 405, 288
    k1p, h1p = _round_up(k1, 128), _round_up(h1, 128)    # 512, 384
    hid = tp["l1_w"].shape[0]                            # 128
    nfeat = tp["l1_w"].shape[1] - action_dim             # 128 conv features
    n2 = nfeat // c2                                     # 4 conv2 positions
    vec_w = max(h1p, _round_up(hid, 128))

    # conv1 weight in im2col row order (kh, kw, in) -> (45, 32)
    wc1 = jnp.transpose(tp["conv1_w"], (2, 3, 1, 0)).reshape(pf, c1)
    # Block-diagonal conv1: one block per conv1-position inside a conv2 window,
    # so  patches(BM, 512) @ w1big  directly yields conv2's im2col rows.
    w1big = jnp.zeros((k1p, h1p), jnp.float32)
    for blk in range(kk):
        w1big = w1big.at[blk * pf:(blk + 1) * pf, blk * c1:(blk + 1) * c1].set(wc1)
    b1big = jnp.pad(jnp.tile(tp["conv1_b"], kk), (0, h1p - h1))

    # conv2 weight in im2col row order (kh, kw, in), K padded 288 -> 384
    wc2 = jnp.transpose(tp["conv2_w"], (2, 3, 1, 0)).reshape(h1, c2)
    wc2 = jnp.pad(wc2, ((0, h1p - h1), (0, 0)))

    # linear1: conv-feature rows reordered from torch's NCHW flatten (c, h, w) to
    # the kernel's (h*w, c) order; action rows split off (no in-kernel concat).
    w1_conv = tp["l1_w"][:, :nfeat]                       # (hid, 128), col = c*n2 + hw
    wl1a = w1_conv.T.reshape(c2, n2, hid).transpose(1, 0, 2).reshape(nfeat, hid)
    wl1b = tp["l1_w"][:, nfeat:].T                        # (A, hid)
    wl2 = tp["l2_w"].T                                    # (hid, hid)

    # Pack all small vectors into one operand (fewer tiny double-buffered DMAs).
    vecs = jnp.zeros((8, vec_w), jnp.float32)
    vecs = vecs.at[0, :h1p].set(b1big)                    # conv1 bias (tiled x9)
    vecs = vecs.at[1, :c2].set(tp["conv2_b"])             # conv2 bias
    vecs = vecs.at[2, :hid].set(tp["l1_b"])               # linear1 bias
    vecs = vecs.at[3, :hid].set(tp["l2_b"])               # linear2 bias
    vecs = vecs.at[4, :hid].set(tp["l3_w"][0])            # linear3 weight row
    vecs = vecs.at[5, 0].set(tp["l3_b"][0])               # linear3 bias
    bf16 = jnp.bfloat16
    return {"w1big": w1big.astype(bf16), "wc2": wc2.astype(bf16),
            "wl1a": wl1a.astype(bf16), "wl1b": wl1b.astype(bf16),
            "wl2": wl2.astype(bf16), "vecs": vecs}


# ---------------------------------------------------------------------------
# Pure-JAX reference of the PyTorch module (for a layout/bookkeeping sanity check)
# ---------------------------------------------------------------------------
def reference_forward(tp, view_state, agent_actions):
    hp = lax.Precision.HIGHEST

    def conv(x, w_oihw, b, s):
        w = jnp.transpose(w_oihw, (2, 3, 1, 0))           # [kh, kw, in, out]
        y = lax.conv_general_dilated(
            x, w, (s, s), "VALID",
            dimension_numbers=("NHWC", "HWIO", "NHWC"), precision=hp)
        return jax.nn.relu(y + b)

    h = conv(view_state, tp["conv1_w"], tp["conv1_b"], 2)
    h = conv(h, tp["conv2_w"], tp["conv2_b"], 2)
    conv_encoded = jnp.transpose(h, (0, 3, 1, 2)).reshape(h.shape[0], -1)  # NCHW flatten
    sa = jnp.concatenate([conv_encoded, agent_actions], axis=-1)
    sa = jax.nn.relu(jnp.dot(sa, tp["l1_w"].T, precision=hp) + tp["l1_b"])
    sa = jax.nn.relu(jnp.dot(sa, tp["l2_w"].T, precision=hp) + tp["l2_b"])
    return jnp.dot(sa, tp["l3_w"].T, precision=hp) + tp["l3_b"]


if __name__ == "__main__":
    key = jax.random.PRNGKey(0)
    k_par, k_view, k_act = jax.random.split(key, 3)

    # 13x13x5 input -> conv(3,s2) -> 6x6x32 -> conv(3,s2) -> 2x2x32 -> flatten 128,
    # matching the module's default input_size=128 for linear1.
    B, Hs, Ws, C = 2, 13, 13, 5
    num_agents, action_size = 2, 4
    action_dim = num_agents * action_size

    torch_params = init_torch_params(k_par, num_agents, action_size,
                                     input_size=128, hidden_size=128)
    kparams = prepare_kernel_params(torch_params, action_dim)

    view_state = jax.random.uniform(k_view, (B, Hs, Ws, C), jnp.float32)
    agent_actions = jax.random.uniform(k_act, (B, action_dim), jnp.float32)

    fwd = jax.jit(centralised_critic_forward)
    q = jax.block_until_ready(fwd(kparams, view_state, agent_actions))
    assert q.shape == (B, 1) and q.dtype == jnp.float32

    # Loose-tolerance check vs a pure-JAX f32 reference of the PyTorch module:
    # catches layout/permutation mistakes, insensitive to bf16-operand rounding.
    q_ref = reference_forward(torch_params, view_state, agent_actions)
    assert bool(jnp.allclose(q, q_ref, rtol=0.1, atol=0.2)), (q, q_ref)
    print("KERNEL_OK")
</pallas_src>

<mosaic_0001>
module attributes {stable_mosaic.version = 11 : i64} {
  func.func @_critic_kernel(%arg0: i32, %arg1: memref<4x8x512xbf16, #tpu.memory_space<vmem>>, %arg2: memref<8x8xf32, #tpu.memory_space<vmem>>, %arg3: memref<512x384xbf16, #tpu.memory_space<vmem>>, %arg4: memref<384x32xbf16, #tpu.memory_space<vmem>>, %arg5: memref<128x128xbf16, #tpu.memory_space<vmem>>, %arg6: memref<8x128xbf16, #tpu.memory_space<vmem>>, %arg7: memref<128x128xbf16, #tpu.memory_space<vmem>>, %arg8: memref<8x384xf32, #tpu.memory_space<vmem>>, %arg9: memref<8x128xf32, #tpu.memory_space<vmem>>) attributes {dimension_semantics = [#tpu.dimension_semantics<parallel>], iteration_bounds = array<i64: 1>, scalar_prefetch = 0 : i64, scratch_operands = 0 : i64, tpu.core_type = #tpu.core_type<tc>, window_params = [{transform_indices = @transform_0, window_bounds = array<i64: 4, 8, 512>}, {transform_indices = @transform_1, window_bounds = array<i64: 8, 8>}, {pipeline_mode = #tpu.pipeline_mode<synchronous>, transform_indices = @transform_2, window_bounds = array<i64: 512, 384>}, {pipeline_mode = #tpu.pipeline_mode<synchronous>, transform_indices = @transform_3, window_bounds = array<i64: 384, 32>}, {pipeline_mode = #tpu.pipeline_mode<synchronous>, transform_indices = @transform_4, window_bounds = array<i64: 128, 128>}, {pipeline_mode = #tpu.pipeline_mode<synchronous>, transform_indices = @transform_5, window_bounds = array<i64: 8, 128>}, {pipeline_mode = #tpu.pipeline_mode<synchronous>, transform_indices = @transform_6, window_bounds = array<i64: 128, 128>}, {pipeline_mode = #tpu.pipeline_mode<synchronous>, transform_indices = @transform_7, window_bounds = array<i64: 8, 384>}, {transform_indices = @transform_8, window_bounds = array<i64: 8, 128>}]} {
    %c0 = arith.constant 0 : index
    %c0_0 = arith.constant 0 : index
    %0 = vector.load %arg8[%c0, %c0_0] : memref<8x384xf32, #tpu.memory_space<vmem>>, vector<1x384xf32>
    %c1 = arith.constant 1 : index
    %c0_1 = arith.constant 0 : index
    %1 = vector.load %arg8[%c1, %c0_1] : memref<8x384xf32, #tpu.memory_space<vmem>>, vector<1x32xf32>
    %c0_2 = arith.constant 0 : index
    %c0_3 = arith.constant 0 : index
    %2 = vector.load %arg2[%c0_2, %c0_3] : memref<8x8xf32, #tpu.memory_space<vmem>>, vector<8x8xf32>
    %3 = arith.truncf %2 : vector<8x8xf32> to vector<8x8xbf16>
    %c0_4 = arith.constant 0 : index
    %c0_5 = arith.constant 0 : index
    %4 = vector.load %arg6[%c0_4, %c0_5] : memref<8x128xbf16, #tpu.memory_space<vmem>>, vector<8x128xbf16>
    %cst = arith.constant dense<0.000000e+00> : vector<8x128xf32>
    %5 = tpu.matmul %3, %4, %cst {dimension_numbers = #tpu.dot_dimension_numbers<[1], [0], [0], [1], [0, 0, 1, 1], [], []>} : vector<8x8xbf16>, vector<8x128xbf16>, vector<8x128xf32> -> vector<8x128xf32>
    %c2 = arith.constant 2 : index
    %c0_6 = arith.constant 0 : index
    %6 = vector.load %arg8[%c2, %c0_6] : memref<8x384xf32, #tpu.memory_space<vmem>>, vector<1x128xf32>
    %7 = vector.broadcast %6 : vector<1x128xf32> to vector<8x128xf32>
    %8 = arith.addf %5, %7 : vector<8x128xf32>
    %c0_7 = arith.constant 0 : index
    %c0_8 = arith.constant 0 : index
    %c0_9 = arith.constant 0 : index
    %9 = vector.load %arg1[%c0_7, %c0_8, %c0_9] : memref<4x8x512xbf16, #tpu.memory_space<vmem>>, vector<1x8x512xbf16>
    %10 = vector.shape_cast %9 : vector<1x8x512xbf16> to vector<8x512xbf16>
    %c0_10 = arith.constant 0 : index
    %c0_11 = arith.constant 0 : index
    %11 = vector.load %arg3[%c0_10, %c0_11] : memref<512x384xbf16, #tpu.memory_space<vmem>>, vector<512x384xbf16>
    %cst_12 = arith.constant dense<0.000000e+00> : vector<8x384xf32>
    %12 = tpu.matmul %10, %11, %cst_12 {dimension_numbers = #tpu.dot_dimension_numbers<[1], [0], [0], [1], [0, 0, 1, 1], [], []>} : vector<8x512xbf16>, vector<512x384xbf16>, vector<8x384xf32> -> vector<8x384xf32>
    %13 = vector.broadcast %0 : vector<1x384xf32> to vector<8x384xf32>
    %14 = arith.addf %12, %13 : vector<8x384xf32>
    %cst_13 = arith.constant 0.000000e+00 : f32
    %15 = vector.broadcast %cst_13 : f32 to vector<8x384xf32>
    %16 = arith.maximumf %14, %15 : vector<8x384xf32>
    %17 = arith.truncf %16 : vector<8x384xf32> to vector<8x384xbf16>
    %c0_14 = arith.constant 0 : index
    %c0_15 = arith.constant 0 : index
    %18 = vector.load %arg4[%c0_14, %c0_15] : memref<384x32xbf16, #tpu.memory_space<vmem>>, vector<384x32xbf16>
    %cst_16 = arith.constant dense<0.000000e+00> : vector<8x32xf32>
    %19 = tpu.matmul %17, %18, %cst_16 {dimension_numbers = #tpu.dot_dimension_numbers<[1], [0], [0], [1], [0, 0, 1, 1], [], []>} : vector<8x384xbf16>, vector<384x32xbf16>, vector<8x32xf32> -> vector<8x32xf32>
    %20 = vector.broadcast %1 : vector<1x32xf32> to vector<8x32xf32>
    %21 = arith.addf %19, %20 : vector<8x32xf32>
    %cst_17 = arith.constant 0.000000e+00 : f32
    %22 = vector.broadcast %cst_17 : f32 to vector<8x32xf32>
    %23 = arith.maximumf %21, %22 : vector<8x32xf32>
    %24 = arith.truncf %23 : vector<8x32xf32> to vector<8x32xbf16>
    %c0_18 = arith.constant 0 : index
    %c0_19 = arith.constant 0 : index
    %25 = vector.load %arg5[%c0_18, %c0_19] : memref<128x128xbf16, #tpu.memory_space<vmem>>, vector<32x128xbf16>
    %cst_20 = arith.constant dense<0.000000e+00> : vector<8x128xf32>
    %26 = tpu.matmul %24, %25, %cst_20 {dimension_numbers = #tpu.dot_dimension_numbers<[1], [0], [0], [1], [0, 0, 1, 1], [], []>} : vector<8x32xbf16>, vector<32x128xbf16>, vector<8x128xf32> -> vector<8x128xf32>
    %27 = arith.addf %8, %26 : vector<8x128xf32>
    %c1_21 = arith.constant 1 : index
    %c0_22 = arith.constant 0 : index
    %c0_23 = arith.constant 0 : index
    %28 = vector.load %arg1[%c1_21, %c0_22, %c0_23] : memref<4x8x512xbf16, #tpu.memory_space<vmem>>, vector<1x8x512xbf16>
    %29 = vector.shape_cast %28 : vector<1x8x512xbf16> to vector<8x512xbf16>
    %c0_24 = arith.constant 0 : index
    %c0_25 = arith.constant 0 : index
    %30 = vector.load %arg3[%c0_24, %c0_25] : memref<512x384xbf16, #tpu.memory_space<vmem>>, vector<512x384xbf16>
    %cst_26 = arith.constant dense<0.000000e+00> : vector<8x384xf32>
    %31 = tpu.matmul %29, %30, %cst_26 {dimension_numbers = #tpu.dot_dimension_numbers<[1], [0], [0], [1], [0, 0, 1, 1], [], []>} : vector<8x512xbf16>, vector<512x384xbf16>, vector<8x384xf32> -> vector<8x384xf32>
    %32 = vector.broadcast %0 : vector<1x384xf32> to vector<8x384xf32>
    %33 = arith.addf %31, %32 : vector<8x384xf32>
    %cst_27 = arith.constant 0.000000e+00 : f32
    %34 = vector.broadcast %cst_27 : f32 to vector<8x384xf32>
    %35 = arith.maximumf %33, %34 : vector<8x384xf32>
    %36 = arith.truncf %35 : vector<8x384xf32> to vector<8x384xbf16>
    %c0_28 = arith.constant 0 : index
    %c0_29 = arith.constant 0 : index
    %37 = vector.load %arg4[%c0_28, %c0_29] : memref<384x32xbf16, #tpu.memory_space<vmem>>, vector<384x32xbf16>
    %cst_30 = arith.constant dense<0.000000e+00> : vector<8x32xf32>
    %38 = tpu.matmul %36, %37, %cst_30 {dimension_numbers = #tpu.dot_dimension_numbers<[1], [0], [0], [1], [0, 0, 1, 1], [], []>} : vector<8x384xbf16>, vector<384x32xbf16>, vector<8x32xf32> -> vector<8x32xf32>
    %39 = vector.broadcast %1 : vector<1x32xf32> to vector<8x32xf32>
    %40 = arith.addf %38, %39 : vector<8x32xf32>
    %cst_31 = arith.constant 0.000000e+00 : f32
    %41 = vector.broadcast %cst_31 : f32 to vector<8x32xf32>
    %42 = arith.maximumf %40, %41 : vector<8x32xf32>
    %43 = arith.truncf %42 : vector<8x32xf32> to vector<8x32xbf16>
    %c32 = arith.constant 32 : index
    %c0_32 = arith.constant 0 : index
    %44 = vector.load %arg5[%c32, %c0_32] : memref<128x128xbf16, #tpu.memory_space<vmem>>, vector<32x128xbf16>
    %cst_33 = arith.constant dense<0.000000e+00> : vector<8x128xf32>
    %45 = tpu.matmul %43, %44, %cst_33 {dimension_numbers = #tpu.dot_dimension_numbers<[1], [0], [0], [1], [0, 0, 1, 1], [], []>} : vector<8x32xbf16>, vector<32x128xbf16>, vector<8x128xf32> -> vector<8x128xf32>
    %46 = arith.addf %27, %45 : vector<8x128xf32>
    %c2_34 = arith.constant 2 : index
    %c0_35 = arith.constant 0 : index
    %c0_36 = arith.constant 0 : index
    %47 = vector.load %arg1[%c2_34, %c0_35, %c0_36] : memref<4x8x512xbf16, #tpu.memory_space<vmem>>, vector<1x8x512xbf16>
    %48 = vector.shape_cast %47 : vector<1x8x512xbf16> to vector<8x512xbf16>
    %c0_37 = arith.constant 0 : index
    %c0_38 = arith.constant 0 : index
    %49 = vector.load %arg3[%c0_37, %c0_38] : memref<512x384xbf16, #tpu.memory_space<vmem>>, vector<512x384xbf16>
    %cst_39 = arith.constant dense<0.000000e+00> : vector<8x384xf32>
    %50 = tpu.matmul %48, %49, %cst_39 {dimension_numbers = #tpu.dot_dimension_numbers<[1], [0], [0], [1], [0, 0, 1, 1], [], []>} : vector<8x512xbf16>, vector<512x384xbf16>, vector<8x384xf32> -> vector<8x384xf32>
    %51 = vector.broadcast %0 : vector<1x384xf32> to vector<8x384xf32>
    %52 = arith.addf %50, %51 : vector<8x384xf32>
    %cst_40 = arith.constant 0.000000e+00 : f32
    %53 = vector.broadcast %cst_40 : f32 to vector<8x384xf32>
    %54 = arith.maximumf %52, %53 : vector<8x384xf32>
    %55 = arith.truncf %54 : vector<8x384xf32> to vector<8x384xbf16>
    %c0_41 = arith.constant 0 : index
    %c0_42 = arith.constant 0 : index
    %56 = vector.load %arg4[%c0_41, %c0_42] : memref<384x32xbf16, #tpu.memory_space<vmem>>, vector<384x32xbf16>
    %cst_43 = arith.constant dense<0.000000e+00> : vector<8x32xf32>
    %57 = tpu.matmul %55, %56, %cst_43 {dimension_numbers = #tpu.dot_dimension_numbers<[1], [0], [0], [1], [0, 0, 1, 1], [], []>} : vector<8x384xbf16>, vector<384x32xbf16>, vector<8x32xf32> -> vector<8x32xf32>
    %58 = vector.broadcast %1 : vector<1x32xf32> to vector<8x32xf32>
    %59 = arith.addf %57, %58 : vector<8x32xf32>
    %cst_44 = arith.constant 0.000000e+00 : f32
    %60 = vector.broadcast %cst_44 : f32 to vector<8x32xf32>
    %61 = arith.maximumf %59, %60 : vector<8x32xf32>
    %62 = arith.truncf %61 : vector<8x32xf32> to vector<8x32xbf16>
    %c64 = arith.constant 64 : index
    %c0_45 = arith.constant 0 : index
    %63 = vector.load %arg5[%c64, %c0_45] : memref<128x128xbf16, #tpu.memory_space<vmem>>, vector<32x128xbf16>
    %cst_46 = arith.constant dense<0.000000e+00> : vector<8x128xf32>
    %64 = tpu.matmul %62, %63, %cst_46 {dimension_numbers = #tpu.dot_dimension_numbers<[1], [0], [0], [1], [0, 0, 1, 1], [], []>} : vector<8x32xbf16>, vector<32x128xbf16>, vector<8x128xf32> -> vector<8x128xf32>
    %65 = arith.addf %46, %64 : vector<8x128xf32>
    %c3 = arith.constant 3 : index
    %c0_47 = arith.constant 0 : index
    %c0_48 = arith.constant 0 : index
    %66 = vector.load %arg1[%c3, %c0_47, %c0_48] : memref<4x8x512xbf16, #tpu.memory_space<vmem>>, vector<1x8x512xbf16>
    %67 = vector.shape_cast %66 : vector<1x8x512xbf16> to vector<8x512xbf16>
    %c0_49 = arith.constant 0 : index
    %c0_50 = arith.constant 0 : index
    %68 = vector.load %arg3[%c0_49, %c0_50] : memref<512x384xbf16, #tpu.memory_space<vmem>>, vector<512x384xbf16>
    %cst_51 = arith.constant dense<0.000000e+00> : vector<8x384xf32>
    %69 = tpu.matmul %67, %68, %cst_51 {dimension_numbers = #tpu.dot_dimension_numbers<[1], [0], [0], [1], [0, 0, 1, 1], [], []>} : vector<8x512xbf16>, vector<512x384xbf16>, vector<8x384xf32> -> vector<8x384xf32>
    %70 = vector.broadcast %0 : vector<1x384xf32> to vector<8x384xf32>
    %71 = arith.addf %69, %70 : vector<8x384xf32>
    %cst_52 = arith.constant 0.000000e+00 : f32
    %72 = vector.broadcast %cst_52 : f32 to vector<8x384xf32>
    %73 = arith.maximumf %71, %72 : vector<8x384xf32>
    %74 = arith.truncf %73 : vector<8x384xf32> to vector<8x384xbf16>
    %c0_53 = arith.constant 0 : index
    %c0_54 = arith.constant 0 : index
    %75 = vector.load %arg4[%c0_53, %c0_54] : memref<384x32xbf16, #tpu.memory_space<vmem>>, vector<384x32xbf16>
    %cst_55 = arith.constant dense<0.000000e+00> : vector<8x32xf32>
    %76 = tpu.matmul %74, %75, %cst_55 {dimension_numbers = #tpu.dot_dimension_numbers<[1], [0], [0], [1], [0, 0, 1, 1], [], []>} : vector<8x384xbf16>, vector<384x32xbf16>, vector<8x32xf32> -> vector<8x32xf32>
    %77 = vector.broadcast %1 : vector<1x32xf32> to vector<8x32xf32>
    %78 = arith.addf %76, %77 : vector<8x32xf32>
    %cst_56 = arith.constant 0.000000e+00 : f32
    %79 = vector.broadcast %cst_56 : f32 to vector<8x32xf32>
    %80 = arith.maximumf %78, %79 : vector<8x32xf32>
    %81 = arith.truncf %80 : vector<8x32xf32> to vector<8x32xbf16>
    %c96 = arith.constant 96 : index
    %c0_57 = arith.constant 0 : index
    %82 = vector.load %arg5[%c96, %c0_57] : memref<128x128xbf16, #tpu.memory_space<vmem>>, vector<32x128xbf16>
    %cst_58 = arith.constant dense<0.000000e+00> : vector<8x128xf32>
    %83 = tpu.matmul %81, %82, %cst_58 {dimension_numbers = #tpu.dot_dimension_numbers<[1], [0], [0], [1], [0, 0, 1, 1], [], []>} : vector<8x32xbf16>, vector<32x128xbf16>, vector<8x128xf32> -> vector<8x128xf32>
    %84 = arith.addf %65, %83 : vector<8x128xf32>
    %cst_59 = arith.constant 0.000000e+00 : f32
    %85 = vector.broadcast %cst_59 : f32 to vector<8x128xf32>
    %86 = arith.maximumf %84, %85 : vector<8x128xf32>
    %87 = arith.truncf %86 : vector<8x128xf32> to vector<8x128xbf16>
    %c0_60 = arith.constant 0 : index
    %c0_61 = arith.constant 0 : index
    %88 = vector.load %arg7[%c0_60, %c0_61] : memref<128x128xbf16, #tpu.memory_space<vmem>>, vector<128x128xbf16>
    %cst_62 = arith.constant dense<0.000000e+00> : vector<8x128xf32>
    %89 = tpu.matmul %87, %88, %cst_62 {dimension_numbers = #tpu.dot_dimension_numbers<[1], [0], [0], [1], [0, 0, 1, 1], [], []>} : vector<8x128xbf16>, vector<128x128xbf16>, vector<8x128xf32> -> vector<8x128xf32>
    %c3_63 = arith.constant 3 : index
    %c0_64 = arith.constant 0 : index
    %90 = vector.load %arg8[%c3_63, %c0_64] : memref<8x384xf32, #tpu.memory_space<vmem>>, vector<1x128xf32>
    %91 = vector.broadcast %90 : vector<1x128xf32> to vector<8x128xf32>
    %92 = arith.addf %89, %91 : vector<8x128xf32>
    %cst_65 = arith.constant 0.000000e+00 : f32
    %93 = vector.broadcast %cst_65 : f32 to vector<8x128xf32>
    %94 = arith.maximumf %92, %93 : vector<8x128xf32>
    %c4 = arith.constant 4 : index
    %c0_66 = arith.constant 0 : index
    %95 = vector.load %arg8[%c4, %c0_66] : memref<8x384xf32, #tpu.memory_space<vmem>>, vector<1x128xf32>
    %96 = vector.broadcast %95 : vector<1x128xf32> to vector<8x128xf32>
    %97 = arith.mulf %94, %96 : vector<8x128xf32>
    %cst_67 = arith.constant dense<0.000000e+00> : vector<8xf32>
    %98 = vector.multi_reduction <add>, %97, %cst_67 [1] : vector<8x128xf32> to vector<8xf32>
    %99 = vector.shape_cast %98 : vector<8xf32> to vector<8x1xf32>
    %c5 = arith.constant 5 : index
    %c0_68 = arith.constant 0 : index
    %100 = vector.load %arg8[%c5, %c0_68] : memref<8x384xf32, #tpu.memory_space<vmem>>, vector<1x1xf32>
    %101 = vector.broadcast %100 : vector<1x1xf32> to vector<8x1xf32>
    %102 = arith.addf %99, %101 : vector<8x1xf32>
    %103 = vector.shape_cast %102 : vector<8x1xf32> to vector<8x1xf32>
    %104 = vector.broadcast %103 : vector<8x1xf32> to vector<8x128xf32>
    %c0_69 = arith.constant 0 : index
    %c0_70 = arith.constant 0 : index
    %105 = vector.load %arg9[%c0_69, %c0_70] : memref<8x128xf32, #tpu.memory_space<vmem>>, vector<8x128xf32>
    tpu.vector_store %arg9[%c0_69, %c0_70], %104 {strides = array<i32>} : memref<8x128xf32, #tpu.memory_space<vmem>>, vector<8x128xf32>,
    return
  }
  func.func @transform_0(%arg0: i32) -> (i32, i32, i32) {
    %c0_i32 = arith.constant 0 : i32
    %c0_i32_0 = arith.constant 0 : i32
    %c0_i32_1 = arith.constant 0 : i32
    return %c0_i32, %arg0, %c0_i32_0 : i32, i32, i32
  }
  func.func @transform_1(%arg0: i32) -> (i32, i32) {
    %c0_i32 = arith.constant 0 : i32
    %c0_i32_0 = arith.constant 0 : i32
    return %arg0, %c0_i32 : i32, i32
  }
  func.func @transform_2(%arg0: i32) -> (i32, i32) {
    %c0_i32 = arith.constant 0 : i32
    %c0_i32_0 = arith.constant 0 : i32
    %c0_i32_1 = arith.constant 0 : i32
    return %c0_i32, %c0_i32_0 : i32, i32
  }
  func.func @transform_3(%arg0: i32) -> (i32, i32) {
    %c0_i32 = arith.constant 0 : i32
    %c0_i32_0 = arith.constant 0 : i32
    %c0_i32_1 = arith.constant 0 : i32
    return %c0_i32, %c0_i32_0 : i32, i32
  }
  func.func @transform_4(%arg0: i32) -> (i32, i32) {
    %c0_i32 = arith.constant 0 : i32
    %c0_i32_0 = arith.constant 0 : i32
    %c0_i32_1 = arith.constant 0 : i32
    return %c0_i32, %c0_i32_0 : i32, i32
  }
  func.func @transform_5(%arg0: i32) -> (i32, i32) {
    %c0_i32 = arith.constant 0 : i32
    %c0_i32_0 = arith.constant 0 : i32
    %c0_i32_1 = arith.constant 0 : i32
    return %c0_i32, %c0_i32_0 : i32, i32
  }
  func.func @transform_6(%arg0: i32) -> (i32, i32) {
    %c0_i32 = arith.constant 0 : i32
    %c0_i32_0 = arith.constant 0 : i32
    %c0_i32_1 = arith.constant 0 : i32
    return %c0_i32, %c0_i32_0 : i32, i32
  }
  func.func @transform_7(%arg0: i32) -> (i32, i32) {
    %c0_i32 = arith.constant 0 : i32
    %c0_i32_0 = arith.constant 0 : i32
    %c0_i32_1 = arith.constant 0 : i32
    return %c0_i32, %c0_i32_0 : i32, i32
  }
  func.func @transform_8(%arg0: i32) -> (i32, i32) {
    %c0_i32 = arith.constant 0 : i32
    %c0_i32_0 = arith.constant 0 : i32
    return %arg0, %c0_i32 : i32, i32
  }
}

</mosaic_0001>

<bundles_post_ra>
// kernel: centralised_critic_forward.1
= control target key start
LH: loop header
LB: loop body
LE: loop exit
PB: predicated region body
PF: predicated region fallthrough
CT: control target
= control target key end

     0   :  { %v5111_v1 = vmov 0.0   ;;  %vm3338_vm0 = vmmov 0   ;;  %vm40_vm1 = vcmask 1043456   ;;  %vm36_vm2 = vcmask 64512   ;;  %s5102_s2 = inlined_call_operand.vmem [shape: bf16[512,384], index: 2, kind: input, shape index: {}]   ;;  %s5103_s5 = inlined_call_operand.vmem [shape: bf16[8,128], index: 5, kind: input, shape index: {}]   ;;  %s5104_s0 = inlined_call_operand.vmem [shape: bf16[4,8,512], index: 0, kind: input, shape index: {}]   ;;  %s5105_s1 = inlined_call_operand.vmem [shape: f32[8,8], index: 1, kind: input, shape index: {}]   ;;  %s5106_s3 = inlined_call_operand.vmem [shape: bf16[384,32], index: 3, kind: input, shape index: {}]   ;;  %s5107_s7 = inlined_call_operand.vmem [shape: f32[8,384], index: 7, kind: input, shape index: {}]   ;;  %s5108_s4 = inlined_call_operand.vmem [shape: bf16[128,128], index: 4, kind: input, shape index: {}]   ;;  %s5109_s6 = inlined_call_operand.vmem [shape: bf16[128,128], index: 6, kind: input, shape index: {}]   ;;  %s5110_s8 = inlined_call_operand.vmem [shape: f32[8,128], index: 8, kind: output, shape index: {}]  }
   0x1   :  { %v3388_v0 = vld [vmem:[%s5102_s2 + $0x4] ss:$12 sps:$4 sm:$0xff]   ;;  %2850 = vmatprep.subr.bf16.mxu0 %v5111_v1  ;;  %2852 = vmatprep.mubr.msk.bf16.mxu0 %vm3338_vm0, %v5111_v1  ;;  %v3396_v2 = vld [vmem:[%s5102_s2] ss:$12 sps:$4 sm:$0xff]   ;;  %v3402_v3 = vld [vmem:[%s5102_s2 + $0x1c] ss:$12 sps:$4 sm:$0xff]  }
   0x2   :  { %756 = vmatprep.subr.bf16.mxu1 %v3388_v0  ;;  %v3408_v4 = vld [vmem:[%s5102_s2 + $0x18] ss:$12 sps:$4 sm:$0xff]   ;;  %v3414_v5 = vld [vmem:[%s5102_s2 + $0x34] ss:$12 sps:$4 sm:$0xff]   ;;  %v3420_v6 = vld [vmem:[%s5102_s2 + $0x30] ss:$12 sps:$4 sm:$0xff]  }
   0x3   :  { %757 = vmatpush1.bf16.msra.mxu1 %v3396_v2  ;;  %v3426_v7 = vld [vmem:[%s5102_s2 + $0x4c] ss:$12 sps:$4 sm:$0xff]   ;;  %v3432_v8 = vld [vmem:[%s5102_s2 + $0x48] ss:$12 sps:$4 sm:$0xff]   ;;  %v3438_v9 = vld [vmem:[%s5102_s2 + $0x64] ss:$12 sps:$4 sm:$0xff]  }
   0x4   :  { %758 = vmatprep.subr.bf16.mxu1 %v3402_v3  ;;  %v3444_v10 = vld [vmem:[%s5102_s2 + $0x60] ss:$12 sps:$4 sm:$0xff]   ;;  %v3450_v11 = vld [vmem:[%s5102_s2 + $0x7c] ss:$12 sps:$4 sm:$0xff]   ;;  %v3456_v12 = vld [vmem:[%s5102_s2 + $0x78] ss:$12 sps:$4 sm:$0xff]  }
   0x5   :  { %v3462_v13 = vld [vmem:[%s5102_s2 + $0x94] ss:$12 sps:$4 sm:$0xff]   ;;  %v3475_v16 = vld [vmem:[%s5102_s2 + $0x90] ss:$12 sps:$4 sm:$0xff]   ;;  %v3487_v20 = vld [vmem:[%s5102_s2 + $0xac] ss:$12 sps:$4 sm:$0xff]  }
   0x6   :  { %v34_v14 = vld [vmem:[%s5103_s5] sm:$0xf]  ;;  %v3085_v19 = vld [vmem:[%s5102_s2 + $0xc8] ss:$12 sps:$4 sm:$0xff]   ;;  %v3504_v25 = vld [vmem:[%s5102_s2 + $0xc4] ss:$12 sps:$4 sm:$0xff]  }
   0x7   :  { %759 = vmatpush1.bf16.msra.mxu1 %v3408_v4  ;;  %v3470_v15 = vld [vmem:[%s5104_s0] sm:$0xff]  ;;  %v42_v17 = vsel %vm40_vm1, %v34_v14, 0  ;;  %v3087_v23 = vld [vmem:[%s5102_s2 + $0x8] ss:$12 sps:$4 sm:$0xff]   ;;  %v3100_v33 = vld [vmem:[%s5102_s2 + $0x110] ss:$12 sps:$4 sm:$0xff]  }
   0x8   :  { %760 = vmatprep.subr.bf16.mxu1 %v3414_v5  ;;  %v2366_v18 = vcombine.high %v3470_v15, %v3470_v15  ;;  %2851 = vmatpush3.bf16.msra.mxu0 %v42_v17  ;;  %v32_v21 = vld [vmem:[%s5105_s1] sm:$0xff]  ;;  %v3498_v24 = vld [vmem:[%s5102_s2 + $0xa8] ss:$12 sps:$4 sm:$0xff]   ;;  %v3102_v35 = vld [vmem:[%s5102_s2 + $0x50] ss:$12 sps:$4 sm:$0xff]   ;;  %v2365_v56 = vcombine.low %v3470_v15, %v3470_v15  ;;  %vm1214_vm3 = vcmask 261120  }
   0x9   :  { %2529 = vmatprep.subr.bf16.mxu0 %v3085_v19  ;;  %v33_v22 = vpack.c.bf16 %v32_v21, %v32_v21  ;;  %v3090_v26 = vld [vmem:[%s5102_s2 + $0xe0] ss:$12 sps:$4 sm:$0xff]   ;;  %v3095_v29 = vld [vmem:[%s5102_s2 + $0xf8] ss:$12 sps:$4 sm:$0xff]   ;;  %v3525_v30 = vld [vmem:[%s5102_s2 + $0xdc] ss:$12 sps:$4 sm:$0xff]  }
   0xa   :  { %788 = vmatprep.mubr.bf16.mxu1 %v2366_v18  ;;  %v3092_v27 = vld [vmem:[%s5102_s2 + $0x20] ss:$12 sps:$4 sm:$0xff]   ;;  %v3097_v31 = vld [vmem:[%s5102_s2 + $0x38] ss:$12 sps:$4 sm:$0xff]   ;;  %v3105_v36 = vld [vmem:[%s5102_s2 + $0x128] ss:$12 sps:$4 sm:$0xff]  }
   0xb   :  { %761 = vmatpush1.bf16.msra.mxu1 %v3420_v6  ;;  %2853 = vmatmul.mubr.msk.bf16.vlgmr.msra.gmra.mrb[0].mxu0 %vm36_vm2, %v33_v22  ;;  %v3516_v28 = vld [vmem:[%s5102_s2 + $0xc0] ss:$12 sps:$4 sm:$0xff]   ;;  %v3534_v32 = vld [vmem:[%s5102_s2 + $0xd8] ss:$12 sps:$4 sm:$0xff]   ;;  %v3555_v37 = vld [vmem:[%s5102_s2 + $0xf0] ss:$12 sps:$4 sm:$0xff]  }
   0xc   :  { %762 = vmatprep.subr.bf16.mxu1 %v3426_v7  ;;  %2530 = vmatpush3.bf16.msra.mxu0 %v3087_v23  ;;  %v3543_v34 = vld [vmem:[%s5102_s2 + $0xf4] ss:$12 sps:$4 sm:$0xff]   ;;  %v3561_v38 = vld [vmem:[%s5102_s2 + $0x10c] ss:$12 sps:$4 sm:$0xff]   ;;  %v3584_v42 = vld [vmem:[%s5102_s2 + $0x124] ss:$12 sps:$4 sm:$0xff]  }
   0xd   :  { %2531 = vmatprep.subr.bf16.mxu0 %v3090_v26  ;;  %870 = vmatprep.mubr.bf16.mxu0 %v2366_v18  ;;  %v3567_v39 = vld [vmem:[%s5102_s2 + $0x68] ss:$12 sps:$4 sm:$0xff]   ;;  %v3572_v40 = vld [vmem:[%s5102_s2 + $0x140] ss:$12 sps:$4 sm:$0xff]   ;;  %v3596_v44 = vld [vmem:[%s5102_s2 + $0x158] ss:$12 sps:$4 sm:$0xff]  }
   0xe   :  { %5184 = vst [vmem:[#allocation2_spill] sm:$0xff] %v3567_v39  ;;  %5185 = vst [vmem:[#allocation3_spill] sm:$0xff] %v3572_v40  ;;  %v3578_v41 = vld [vmem:[%s5102_s2 + $0x108] ss:$12 sps:$4 sm:$0xff]   ;;  %v3590_v43 = vld [vmem:[%s5102_s2 + $0x80] ss:$12 sps:$4 sm:$0xff]  }
   0xf   :  { %763 = vmatpush1.bf16.msra.mxu1 %v3432_v8  ;;  %5186 = vst [vmem:[#allocation4_spill] sm:$0xff] %v3590_v43  ;;  %5187 = vst [vmem:[#allocation5_spill] sm:$0xff] %v3596_v44  ;;  %v3602_v45 = vld [vmem:[%s5102_s2 + $0x120] ss:$12 sps:$4 sm:$0xff]   ;;  %v3607_v46 = vld [vmem:[%s5102_s2 + $0x13c] ss:$12 sps:$4 sm:$0xff]  }
  0x10   :  { %764 = vmatprep.subr.bf16.mxu1 %v3438_v9  ;;  %2532 = vmatpush3.bf16.msra.mxu0 %v3092_v27  ;;  %v3614_v47 = vld [vmem:[%s5102_s2 + $0x98] ss:$12 sps:$4 sm:$0xff]   ;;  %v3620_v48 = vld [vmem:[%s5102_s2 + $0x170] ss:$12 sps:$4 sm:$0xff]   ;;  %v3631_v50 = vld [vmem:[%s5102_s2 + $0x154] ss:$12 sps:$4 sm:$0xff]  }
  0x11   :  { %2533 = vmatprep.subr.bf16.mxu0 %v3095_v29  ;;  %5188 = vst [vmem:[#allocation6_spill] sm:$0xff] %v3614_v47  ;;  %5189 = vst [vmem:[#allocation7_spill] sm:$0xff] %v3620_v48  ;;  %v3625_v49 = vld [vmem:[%s5102_s2 + $0x138] ss:$12 sps:$4 sm:$0xff]   ;;  %v3638_v51 = vld [vmem:[%s5102_s2 + $0xb0] ss:$12 sps:$4 sm:$0xff]  }
  0x12   :  { %5190 = vst [vmem:[#allocation8_spill] sm:$0xff] %v3638_v51  ;;  %v3644_v52 = vld [vmem:[%s5102_s2 + $0x248] ss:$12 sps:$4 sm:$0xff]   ;;  %v3649_v53 = vld [vmem:[%s5102_s2 + $0x150] ss:$12 sps:$4 sm:$0xff]  }
  0x13   :  { %765 = vmatpush1.bf16.msra.mxu1 %v3444_v10  ;;  %5191 = vst [vmem:[#allocation9_spill] sm:$0xff] %v3644_v52  ;;  %v3655_v54 = vld [vmem:[%s5102_s2 + $0x16c] ss:$12 sps:$4 sm:$0xff]   ;;  %v3662_v55 = vld [vmem:[%s5102_s2 + $0x188] ss:$12 sps:$4 sm:$0xff]  }
  0x14   :  { %766 = vmatprep.subr.bf16.mxu1 %v3450_v11  ;;  %2534 = vmatpush3.bf16.msra.mxu0 %v3097_v31  ;;  %5192 = vst [vmem:[#allocation10_spill] sm:$0xff] %v3662_v55  ;;  %v3670_v57 = vld [vmem:[%s5102_s2 + $0x260] ss:$12 sps:$4 sm:$0xff]   ;;  %v3675_v58 = vld [vmem:[%s5102_s2 + $0x168] ss:$12 sps:$4 sm:$0xff]  }
  0x15   :  { %2535 = vmatprep.subr.bf16.mxu0 %v3100_v33  ;;  %5193 = vst [vmem:[#allocation11_spill] sm:$0xff] %v3670_v57  ;;  %v3681_v59 = vld [vmem:[%s5102_s2 + $0x184] ss:$12 sps:$4 sm:$0xff]   ;;  %v3688_v60 = vld [vmem:[%s5102_s2 + $0x1a0] ss:$12 sps:$4 sm:$0xff]  }
  0x16   :  { %5194 = vst [vmem:[#allocation12_spill] sm:$0xff] %v3688_v60  ;;  %v3694_v61 = vld [vmem:[%s5102_s2 + $0x278] ss:$12 sps:$4 sm:$0xff]   ;;  %v3700_v62 = vld [vmem:[%s5102_s2 + $0x180] ss:$12 sps:$4 sm:$0xff]  }
  0x17   :  { %767 = vmatpush1.bf16.msra.mxu1 %v3456_v12  ;;  %5195 = vst [vmem:[#allocation13_spill] sm:$0xff] %v3694_v61  ;;  %v3706_v63 = vld [vmem:[%s5102_s2 + $0x19c] ss:$12 sps:$4 sm:$0xff]   ;;  %v3712_v14 = vld [vmem:[%s5102_s2 + $0x1b8] ss:$12 sps:$4 sm:$0xff]  }
  0x18   :  { %768 = vmatprep.subr.bf16.mxu1 %v3462_v13  ;;  %2536 = vmatpush3.bf16.msra.mxu0 %v3102_v35  ;;  %5196 = vst [vmem:[#allocation14_spill] sm:$0xff] %v3712_v14  ;;  %v3718_v15 = vld [vmem:[%s5102_s2 + $0x290] ss:$12 sps:$4 sm:$0xff]   ;;  %v3724_v17 = vld [vmem:[%s5102_s2 + $0x198] ss:$12 sps:$4 sm:$0xff]   ;;  %v85_v33 = vld [vmem:[%s5104_s0 + $0x8] sm:$0xff] }
  0x19   :  { %2537 = vmatprep.subr.bf16.mxu0 %v3105_v36  ;;  %5197 = vst [vmem:[#allocation15_spill] sm:$0xff] %v3718_v15  ;;  %v3729_v18 = vld [vmem:[%s5102_s2 + $0x1b4] ss:$12 sps:$4 sm:$0xff]   ;;  %v3736_v19 = vld [vmem:[%s5102_s2 + $0x1d0] ss:$12 sps:$4 sm:$0xff]   ;;  %v2368_v36 = vcombine.high %v85_v33, %v85_v33 }
  0x1a   :  { %5198 = vst [vmem:[#allocation16_spill] sm:$0xff] %v3736_v19  ;;  %v3742_v21 = vld [vmem:[%s5102_s2 + $0x2a8] ss:$12 sps:$4 sm:$0xff]   ;;  %v3747_v22 = vld [vmem:[%s5102_s2 + $0x1b0] ss:$12 sps:$4 sm:$0xff]  }
  0x1b   :  { %769 = vmatpush1.bf16.msra.mxu1 %v3475_v16  ;;  %5199 = vst [vmem:[#allocation17_spill] sm:$0xff] %v3742_v21  ;;  %v3753_v23 = vld [vmem:[%s5102_s2 + $0x1cc] ss:$12 sps:$4 sm:$0xff]   ;;  %v3760_v26 = vld [vmem:[%s5102_s2 + $0x1e8] ss:$12 sps:$4 sm:$0xff]  }
  0x1c   :  { %770 = vmatprep.subr.bf16.mxu1 %v3487_v20  ;;  %2538 = vmatpush3.bf16.msra.mxu0 %v3567_v39  ;;  %5200 = vst [vmem:[#allocation18_spill] sm:$0xff] %v3760_v26  ;;  %v3766_v27 = vld [vmem:[%s5102_s2 + $0x2c0] ss:$12 sps:$4 sm:$0xff]   ;;  %v3771_v29 = vld [vmem:[%s5102_s2 + $0x1c8] ss:$12 sps:$4 sm:$0xff]  }
  0x1d   :  { %2539 = vmatprep.subr.bf16.mxu0 %v3572_v40  ;;  %5201 = vst [vmem:[#allocation19_spill] sm:$0xff] %v3766_v27  ;;  %v3777_v31 = vld [vmem:[%s5102_s2 + $0x1e4] ss:$12 sps:$4 sm:$0xff]   ;;  %v3787_v35 = vld [vmem:[%s5102_s2 + $0x200] ss:$12 sps:$4 sm:$0xff]  }
  0x1e   :  { %5202 = vst [vmem:[#allocation20_spill] sm:$0xff] %v3787_v35  ;;  %v3798_v1 = vld [vmem:[%s5102_s2 + $0x1e0] ss:$12 sps:$4 sm:$0xff]   ;;  %v3999_v40 = vld [vmem:[%s5102_s2 + $0x2d0] ss:$12 sps:$4 sm:$0xff]  }
  0x1f   :  { %771 = vmatpush1.bf16.msra.mxu1 %v3498_v24  ;;  %5223 = vst [vmem:[#allocation41_spill] sm:$0xff] %v3999_v40  ;;  %v4005_v39 = vld [vmem:[%s5102_s2 + $0x2ec] ss:$12 sps:$4 sm:$0xff]  }
  0x20   :  { %772 = vmatprep.subr.bf16.mxu1 %v3504_v25  ;;  %2540 = vmatpush3.bf16.msra.mxu0 %v3590_v43  ;;  %v3993_v43 = vld [vmem:[%s5102_s2 + $0x2d4] ss:$12 sps:$4 sm:$0xff]   ;;  %5224 = vst [vmem:[#allocation42_spill] sm:$0xff] %v4005_v39 }
  0x21   :  { %2541 = vmatprep.subr.bf16.mxu0 %v3596_v44  ;;  %v3981_v44 = vld [vmem:[%s5102_s2 + $0x2bc] ss:$12 sps:$4 sm:$0xff]   ;;  %5222 = vst [vmem:[#allocation40_spill] sm:$0xff] %v3993_v43 }
  0x22   :  { %5220 = vst [vmem:[#allocation38_spill] sm:$0xff] %v3981_v44 }
  0x23   :  { %773 = vmatpush1.bf16.msra.mxu1 %v3516_v28 }
  0x24   :  { %774 = vmatprep.subr.bf16.mxu1 %v3525_v30  ;;  %2542 = vmatpush3.bf16.msra.mxu0 %v3614_v47  ;;  %v3962_v47 = vld [vmem:[%s5102_s2 + $0x288] ss:$12 sps:$4 sm:$0xff]  }
  0x25   :  { %2543 = vmatprep.subr.bf16.mxu0 %v3620_v48  ;;  %v3943_v48 = vld [vmem:[%s5102_s2 + $0x270] ss:$12 sps:$4 sm:$0xff]  }
  0x27   :  { %775 = vmatpush1.bf16.msra.mxu1 %v3534_v32 }
  0x28   :  { %776 = vmatprep.subr.bf16.mxu1 %v3543_v34  ;;  %2544 = vmatpush3.bf16.msra.mxu0 %v3638_v51  ;;  %v3937_v51 = vld [vmem:[%s5106_s3 + $0x60] sm:$0xff]  }
  0x29   :  { %2551 = vmatprep.subr.bf16.mxu0 %v3644_v52  ;;  %v3919_v52 = vld [vmem:[%s5102_s2 + $0x258] ss:$12 sps:$4 sm:$0xff]   ;;  %5217 = vst [vmem:[#allocation35_spill] sm:$0xff] %v3937_v51 }
  0x2a   :  { %5215 = vst [vmem:[#allocation33_spill] sm:$0xff] %v3919_v52 }
  0x2b   :  { %777 = vmatpush1.bf16.msra.mxu1 %v3555_v37  ;;  %871 = vmatmul.mubr.bf16.vlgmr.msra.gmra.mrb[4].mxu0 %v2365_v56 }
  0x2c   :  { %778 = vmatprep.subr.bf16.mxu1 %v3561_v38  ;;  %2552 = vmatpush3.bf16.msra.mxu0 %v3662_v55  ;;  %v3901_v55 = vld [vmem:[%s5102_s2 + $0x25c] ss:$12 sps:$4 sm:$0xff]  }
  0x2d   :  { %2553 = vmatprep.subr.bf16.mxu0 %v3670_v57  ;;  %910 = vmatprep.mubr.bf16.mxu0 %v2368_v36  ;;  %v3880_v57 = vld [vmem:[%s5106_s3 + $0x8] sm:$0xff]   ;;  %5212 = vst [vmem:[#allocation30_spill] sm:$0xff] %v3901_v55 }
  0x2e   :  { %5210 = vst [vmem:[#allocation28_spill] sm:$0xff] %v3880_v57 }
  0x2f   :  { %779 = vmatpush1.bf16.msra.mxu1 %v3578_v41 }
  0x30   :  { %780 = vmatprep.subr.bf16.mxu1 %v3584_v42  ;;  %2554 = vmatpush3.bf16.msra.mxu0 %v3688_v60  ;;  %v3869_v60 = vld [vmem:[%s5102_s2 + $0x228] ss:$12 sps:$4 sm:$0xff]  }
  0x31   :  { %2555 = vmatprep.subr.bf16.mxu0 %v3694_v61  ;;  %v2367_v61 = vcombine.low %v85_v33, %v85_v33  ;;  %v3875_v33 = vld [vmem:[%s5102_s2 + $0x244] ss:$12 sps:$4 sm:$0xff]  }
  0x33   :  { %781 = vmatpush1.bf16.msra.mxu1 %v3602_v45 }
  0x34   :  { %782 = vmatprep.subr.bf16.mxu1 %v3607_v46  ;;  %2556 = vmatpush3.bf16.msra.mxu0 %v3712_v14  ;;  %v3856_v14 = vld [vmem:[%s5106_s3] sm:$0xff]  }
  0x35   :  { %2557 = vmatprep.subr.bf16.mxu0 %v3718_v15  ;;  %v3846_v15 = vld [vmem:[%s5106_s3 + $0x40] sm:$0xff]   ;;  %5208 = vst [vmem:[#allocation26_spill] sm:$0xff] %v3856_v14 }
  0x36   :  { %5207 = vst [vmem:[#allocation25_spill] sm:$0xff] %v3846_v15 }
  0x37   :  { %783 = vmatpush1.bf16.msra.mxu1 %v3625_v49 }
  0x38   :  { %784 = vmatprep.subr.bf16.mxu1 %v3631_v50  ;;  %2558 = vmatpush3.bf16.msra.mxu0 %v3736_v19  ;;  %v3840_v19 = vld [vmem:[%s5102_s2 + $0x210] ss:$12 sps:$4 sm:$0xff]  }
  0x39   :  { %2559 = vmatprep.subr.bf16.mxu0 %v3742_v21  ;;  %v3822_v21 = vld [vmem:[%s5102_s2 + $0x1f8] ss:$12 sps:$4 sm:$0xff]  }
  0x3b   :  { %785 = vmatpush1.bf16.msra.mxu1 %v3649_v53 }
  0x3c   :  { %786 = vmatprep.subr.bf16.mxu1 %v3655_v54  ;;  %2560 = vmatpush3.bf16.msra.mxu0 %v3760_v26  ;;  %v3804_v26 = vld [vmem:[%s5102_s2 + $0x1fc] ss:$12 sps:$4 sm:$0xff]  }
  0x3d   :  { %2561 = vmatprep.subr.bf16.mxu0 %v3766_v27  ;;  %v3811_v27 = vld [vmem:[%s5102_s2 + $0x218] ss:$12 sps:$4 sm:$0xff]  }
  0x3e   :  { %5204 = vst [vmem:[#allocation22_spill] sm:$0xff] %v3811_v27 }
  0x3f   :  { %787 = vmatpush1.bf16.msra.mxu1 %v3675_v58 }
  0x40   :  { %797 = vmatprep.subr.bf16.mxu1 %v3681_v59  ;;  %2562 = vmatpush3.bf16.msra.mxu0 %v3787_v35  ;;  %v3828_v35 = vld [vmem:[%s5102_s2 + $0x214] ss:$12 sps:$4 sm:$0xff]  }
  0x42   :  { %789 = vmatmul.mubr.bf16.vlgmr.msra.gmra.mrb[0].mxu1 %v2365_v56  ;;  %v3793_v56 = vld [vmem:[%s5102_s2 + $0x2d8] ss:$12 sps:$4 sm:$0xff]  }
  0x43   :  { %798 = vmatpush1.bf16.msra.mxu1 %v3700_v62  ;;  %5203 = vst [vmem:[#allocation21_spill] sm:$0xff] %v3793_v56  ;;  %829 = vmatprep.mubr.bf16.mxu1 %v2368_v36  ;;  %v3817_v36 = vld [vmem:[%s5102_s2 + $0x2f0] ss:$12 sps:$4 sm:$0xff]  }
  0x44   :  { %799 = vmatprep.subr.bf16.mxu1 %v3706_v63  ;;  %2563 = vmatprep.subr.bf16.mxu0 %v3793_v56  ;;  %5205 = vst [vmem:[#allocation23_spill] sm:$0xff] %v3817_v36  ;;  %v3835_v56 = vld [vmem:[%s5102_s2 + $0x230] ss:$12 sps:$4 sm:$0xff]  }
  0x45   :  { %2564 = vmatpush3.bf16.msra.mxu0 %v3811_v27  ;;  %5206 = vst [vmem:[#allocation24_spill] sm:$0xff] %v3835_v56  ;;  %v3851_v27 = vld [vmem:[%s5102_s2 + $0x22c] ss:$12 sps:$4 sm:$0xff]  }
  0x46   :  { %2565 = vmatprep.subr.bf16.mxu0 %v3817_v36  ;;  %v3862_v36 = vld [vmem:[%s5106_s3 + $0x48] sm:$0xff]  }
  0x47   :  { %800 = vmatpush1.bf16.msra.mxu1 %v3724_v17  ;;  %5209 = vst [vmem:[#allocation27_spill] sm:$0xff] %v3862_v36 }
  0x48   :  { %801 = vmatprep.subr.bf16.mxu1 %v3729_v18 }
  0x49   :  { %2566 = vmatpush3.bf16.msra.mxu0 %v3835_v56  ;;  %v3886_v56 = vld [vmem:[%s5106_s3 + $0x50] sm:$0xff]  }
  0x4a   :  { %2573 = vmatprep.subr.bf16.mxu0 %v3846_v15  ;;  %5211 = vst [vmem:[#allocation29_spill] sm:$0xff] %v3886_v56  ;;  %v3895_v15 = vld [vmem:[%s5102_s2 + $0x240] ss:$12 sps:$4 sm:$0xff]  }
  0x4b   :  { %802 = vmatpush1.bf16.msra.mxu1 %v3747_v22 }
  0x4c   :  { %803 = vmatprep.subr.bf16.mxu1 %v3753_v23  ;;  %911 = vmatmul.mubr.bf16.vlgmr.msra.gmra.mrb[8].mxu0 %v2367_v61 }
  0x4d   :  { %2574 = vmatpush3.bf16.msra.mxu0 %v3856_v14  ;;  %v3913_v14 = vld [vmem:[%s5106_s3 + $0x58] sm:$0xff]  }
  0x4e   :  { %2575 = vmatprep.subr.bf16.mxu0 %v3862_v36  ;;  %v3907_v36 = vld [vmem:[%s5106_s3 + $0x10] sm:$0xff]   ;;  %5214 = vst [vmem:[#allocation32_spill] sm:$0xff] %v3913_v14 }
  0x4f   :  { %804 = vmatpush1.bf16.msra.mxu1 %v3771_v29  ;;  %5213 = vst [vmem:[#allocation31_spill] sm:$0xff] %v3907_v36 }
  0x50   :  { %805 = vmatprep.subr.bf16.mxu1 %v3777_v31 }
  0x51   :  { %2576 = vmatpush3.bf16.msra.mxu0 %v3880_v57  ;;  %v3925_v57 = vld [vmem:[%s5102_s2 + $0x274] ss:$12 sps:$4 sm:$0xff]  }
  0x52   :  { %2577 = vmatprep.subr.bf16.mxu0 %v3886_v56  ;;  %v3931_v56 = vld [vmem:[%s5106_s3 + $0x18] sm:$0xff]  }
  0x53   :  { %806 = vmatpush1.bf16.msra.mxu1 %v3798_v1  ;;  %5216 = vst [vmem:[#allocation34_spill] sm:$0xff] %v3931_v56 }
  0x54   :  { %807 = vmatprep.subr.bf16.mxu1 %v3804_v26 }
  0x55   :  { %2578 = vmatpush3.bf16.msra.mxu0 %v3907_v36  ;;  %v3949_v36 = vld [vmem:[%s5102_s2 + $0x28c] ss:$12 sps:$4 sm:$0xff]  }
  0x56   :  { %2579 = vmatprep.subr.bf16.mxu0 %v3913_v14  ;;  %v3955_v14 = vld [vmem:[%s5106_s3 + $0x20] sm:$0xff]  }
  0x57   :  { %808 = vmatpush1.bf16.msra.mxu1 %v3822_v21  ;;  %5218 = vst [vmem:[#allocation36_spill] sm:$0xff] %v3955_v14 }
  0x58   :  { %809 = vmatprep.subr.bf16.mxu1 %v3828_v35 }
  0x59   :  { %2580 = vmatpush3.bf16.msra.mxu0 %v3931_v56  ;;  %v3968_v56 = vld [vmem:[%s5102_s2 + $0x2a4] ss:$12 sps:$4 sm:$0xff]  }
  0x5a   :  { %2581 = vmatprep.subr.bf16.mxu0 %v3937_v51  ;;  %v3975_v51 = vld [vmem:[%s5102_s2 + $0x2a0] ss:$12 sps:$4 sm:$0xff]  }
  0x5b   :  { %810 = vmatpush1.bf16.msra.mxu1 %v3840_v19  ;;  %5219 = vst [vmem:[#allocation37_spill] sm:$0xff] %v3975_v51 }
  0x5c   :  { %811 = vmatprep.subr.bf16.mxu1 %v3851_v27 }
  0x5d   :  { %2582 = vmatpush3.bf16.msra.mxu0 %v3955_v14  ;;  %v3987_v14 = vld [vmem:[%s5102_s2 + $0x2b8] ss:$12 sps:$4 sm:$0xff]  }
  0x5e   :  { %5221 = vst [vmem:[#allocation39_spill] sm:$0xff] %v3987_v14 }
  0x5f   :  { %812 = vmatpush1.bf16.msra.mxu1 %v3869_v60 }
  0x60   :  { %813 = vmatprep.subr.bf16.mxu1 %v3875_v33 }
  0x63   :  { %814 = vmatpush1.bf16.msra.mxu1 %v3895_v15 }
  0x64   :  { %815 = vmatprep.subr.bf16.mxu1 %v3901_v55 }
  0x67   :  { %816 = vmatpush1.bf16.msra.mxu1 %v3919_v52 }
  0x68   :  { %817 = vmatprep.subr.bf16.mxu1 %v3925_v57 }
  0x6b   :  { %818 = vmatpush1.bf16.msra.mxu1 %v3943_v48 }
  0x6c   :  { %819 = vmatprep.subr.bf16.mxu1 %v3949_v36 }
  0x6f   :  { %820 = vmatpush1.bf16.msra.mxu1 %v3962_v47 }
  0x70   :  { %821 = vmatprep.subr.bf16.mxu1 %v3968_v56 }
  0x73   :  { %822 = vmatpush1.bf16.msra.mxu1 %v3975_v51 }
  0x74   :  { %823 = vmatprep.subr.bf16.mxu1 %v3981_v44  ;;  %v4011_v44 = vld [vmem:[%s5102_s2 + $0x2e8] ss:$12 sps:$4 sm:$0xff]  }
  0x75   :  { %5225 = vst [vmem:[#allocation43_spill] sm:$0xff] %v4011_v44 }
  0x77   :  { %824 = vmatpush1.bf16.msra.mxu1 %v3987_v14 }
  0x78   :  { %825 = vmatprep.subr.bf16.mxu1 %v3993_v43 }
  0x7b   :  { %826 = vmatpush1.bf16.msra.mxu1 %v3999_v40 }
  0x7c   :  { %827 = vmatprep.subr.bf16.mxu1 %v4005_v39  ;;  %v4025_v39 = vld [vmem:[%s5106_s3 + $0x68] sm:$0xff]  }
  0x7d   :  { %2583 = vmatprep.subr.bf16.mxu0 %v4025_v39 }
  0x7f   :  { %828 = vmatpush1.bf16.msra.mxu1 %v4011_v44 }
  0x80   :  { %1276 = vmatprep.subr.bf16.mxu1 %v3388_v0  ;;  %v4033_v0 = vld [vmem:[%s5106_s3 + $0x28] sm:$0xff]  }
  0x81   :  { %2584 = vmatpush3.bf16.msra.mxu0 %v4033_v0 }
  0x82   :  { %830 = vmatmul.mubr.bf16.vlgmr.msra.gmra.mrb[0].mxu1 %v2367_v61  ;;  %v30_v61 = vld [vmem:[%s5107_s7] ss:$8 sm:$0x7] }
  0x83   :  { %1277 = vmatpush1.bf16.msra.mxu1 %v3396_v2  ;;  %v4063_v2 = vld [vmem:[%s5106_s3 + $0x70] sm:$0xff]  }
  0x84   :  { %1278 = vmatprep.subr.bf16.mxu1 %v3402_v3  ;;  %v4068_v3 = vld [vmem:[%s5106_s3 + $0x30] sm:$0xff]   ;;  %2585 = vmatprep.subr.bf16.mxu0 %v4063_v2 }
  0x85   :  { %2586 = vmatpush3.bf16.msra.mxu0 %v4068_v3 }
  0x87   :  { %1279 = vmatpush1.bf16.msra.mxu1 %v3408_v4  ;;  %v4075_v4 = vld [vmem:[%s5106_s3 + $0x78] sm:$0xff]  }
  0x88   :  { %1280 = vmatprep.subr.bf16.mxu1 %v3414_v5  ;;  %v4080_v5 = vld [vmem:[%s5106_s3 + $0x38] sm:$0xff]   ;;  %2587 = vmatprep.subr.bf16.mxu0 %v4075_v4 }
  0x89   :  { %2588 = vmatpush3.bf16.msra.mxu0 %v4080_v5 }
  0x8b   :  { %1281 = vmatpush1.bf16.msra.mxu1 %v3420_v6  ;;  %v5226_v6 = vmov 0.0  }
  0x8c   :  { %1282 = vmatprep.subr.bf16.mxu1 %v3426_v7  ;;  %2856 = vmatprep.subr.bf16.mxu0 %v5226_v6  ;;  %v2492_v7 = vld [vmem:[%s5104_s0 + $0x10] sm:$0xff] }
  0x8f   :  { %1283 = vmatpush1.bf16.msra.mxu1 %v3432_v8  ;;  %v4088_v8 = vcombine.low %v2492_v7, %v2492_v7 }
  0x90   :  { %1284 = vmatprep.subr.bf16.mxu1 %v3438_v9  ;;  %v4090_v9 = vcombine.high %v2492_v7, %v2492_v7 }
  0x92   :  { %1308 = vmatprep.mubr.bf16.mxu1 %v4090_v9 }
  0x93   :  { %1285 = vmatpush1.bf16.msra.mxu1 %v3444_v10 }
  0x94   :  { %1286 = vmatprep.subr.bf16.mxu1 %v3450_v11 }
  0x97   :  { %1287 = vmatpush1.bf16.msra.mxu1 %v3456_v12 }
  0x98   :  { %1288 = vmatprep.subr.bf16.mxu1 %v3462_v13 }
  0x9b   :  { %1289 = vmatpush1.bf16.msra.mxu1 %v3475_v16 }
  0x9c   :  { %1290 = vmatprep.subr.bf16.mxu1 %v3487_v20  ;;  %v215_v20 = vlaneseq }
  0x9f   :  { %1291 = vmatpush1.bf16.msra.mxu1 %v3498_v24  ;;  %v216_v24 = vshrl.u32 %v215_v20, 7 }
  0xa0   :  { %1292 = vmatprep.subr.bf16.mxu1 %v3504_v25 }
  0xa1   :  { %v225_v25 = vsub.s32 2, %v216_v24 }
  0xa3   :  { %1293 = vmatpush1.bf16.msra.mxu1 %v3516_v28  ;;  %v4117_v7 = vrot.slane %v30_v61, %v225_v25  ;;  %v5228_v25 = vld [vmem:[#allocation38_spill] sm:$0xff] }
  0xa4   :  { %1294 = vmatprep.subr.bf16.mxu1 %v3525_v30 }
  0xa5   :  { %5227 = vst [vmem:[#allocation44_spill] sm:$0xff] %v4117_v7 }
  0xa7   :  { %1295 = vmatpush1.bf16.msra.mxu1 %v3534_v32 }
  0xa8   :  { %1296 = vmatprep.subr.bf16.mxu1 %v3543_v34 }
  0xab   :  { %1297 = vmatpush1.bf16.msra.mxu1 %v3555_v37 }
  0xac   :  { %1298 = vmatprep.subr.bf16.mxu1 %v3561_v38 }
  0xaf   :  { %1299 = vmatpush1.bf16.msra.mxu1 %v3578_v41 }
  0xb0   :  { %1300 = vmatprep.subr.bf16.mxu1 %v3584_v42 }
  0xb3   :  { %1301 = vmatpush1.bf16.msra.mxu1 %v3602_v45 }
  0xb4   :  { %1302 = vmatprep.subr.bf16.mxu1 %v3607_v46 }
  0xb7   :  { %1303 = vmatpush1.bf16.msra.mxu1 %v3625_v49 }
  0xb8   :  { %1304 = vmatprep.subr.bf16.mxu1 %v3631_v50 }
  0xbb   :  { %1305 = vmatpush1.bf16.msra.mxu1 %v3649_v53 }
  0xbc   :  { %1306 = vmatprep.subr.bf16.mxu1 %v3655_v54 }
  0xbf   :  { %1307 = vmatpush1.bf16.msra.mxu1 %v3675_v58 }
  0xc0   :  { %1317 = vmatprep.subr.bf16.mxu1 %v3681_v59 }
  0xc2   :  { %1309 = vmatmul.mubr.bf16.vlgmr.msra.gmra.mrb[4].mxu1 %v4088_v8 }
  0xc3   :  { %1318 = vmatpush1.bf16.msra.mxu1 %v3700_v62 }
  0xc4   :  { %1319 = vmatprep.subr.bf16.mxu1 %v3706_v63 }
  0xc7   :  { %1320 = vmatpush1.bf16.msra.mxu1 %v3724_v17 }
  0xc8   :  { %1321 = vmatprep.subr.bf16.mxu1 %v3729_v18 }
  0xcb   :  { %1322 = vmatpush1.bf16.msra.mxu1 %v3747_v22 }
  0xcc   :  { %1323 = vmatprep.subr.bf16.mxu1 %v3753_v23 }
  0xcf   :  { %1324 = vmatpush1.bf16.msra.mxu1 %v3771_v29 }
  0xd0   :  { %1325 = vmatprep.subr.bf16.mxu1 %v3777_v31 }
  0xd3   :  { %1326 = vmatpush1.bf16.msra.mxu1 %v3798_v1 }
  0xd4   :  { %1327 = vmatprep.subr.bf16.mxu1 %v3804_v26 }
  0xd7   :  { %1328 = vmatpush1.bf16.msra.mxu1 %v3822_v21 }
  0xd8   :  { %1329 = vmatprep.subr.bf16.mxu1 %v3828_v35 }
  0xdb   :  { %1330 = vmatpush1.bf16.msra.mxu1 %v3840_v19 }
  0xdc   :  { %1331 = vmatprep.subr.bf16.mxu1 %v3851_v27 }
  0xdf   :  { %1332 = vmatpush1.bf16.msra.mxu1 %v3869_v60 }
  0xe0   :  { %1333 = vmatprep.subr.bf16.mxu1 %v3875_v33 }
  0xe3   :  { %1334 = vmatpush1.bf16.msra.mxu1 %v3895_v15 }
  0xe4   :  { %1335 = vmatprep.subr.bf16.mxu1 %v3901_v55 }
  0xe7   :  { %1336 = vmatpush1.bf16.msra.mxu1 %v3919_v52 }
  0xe8   :  { %1337 = vmatprep.subr.bf16.mxu1 %v3925_v57 }
  0xeb   :  { %1338 = vmatpush1.bf16.msra.mxu1 %v3943_v48 }
  0xec   :  { %1339 = vmatprep.subr.bf16.mxu1 %v3949_v36 }
  0xef   :  { %1340 = vmatpush1.bf16.msra.mxu1 %v3962_v47 }
  0xf0   :  { %1341 = vmatprep.subr.bf16.mxu1 %v3968_v56 }
  0xf3   :  { %1342 = vmatpush1.bf16.msra.mxu1 %v3975_v51 }
  0xf4   :  { %1343 = vmatprep.subr.bf16.mxu1 %v5228_v25 }
  0xf7   :  { %1344 = vmatpush1.bf16.msra.mxu1 %v3987_v14 }
  0xf8   :  { %1345 = vmatprep.subr.bf16.mxu1 %v3993_v43 }
  0xfb   :  { %1346 = vmatpush1.bf16.msra.mxu1 %v3999_v40 }
  0xfe   :  { %v2545_v10 = vpop.f32.mrb[4].mxu0 }
  0xff   :  { %v2546_v11 = vpop.f32.mrb[5].mxu0 }
 0x100   :  { %v2547_v12 = vadd.f32 %v2546_v11, %v2545_v10  ;;  %v2548_v13 = vpop.f32.mrb[6].mxu0 }
 0x101   :  { %v2549_v16 = vpop.f32.mrb[7].mxu0 }
 0x102   :  { %v873_v10 = vadd.f32 %v2547_v12, %v4117_v7  ;;  %v5229_v12 = vld [vmem:[#allocation42_spill] sm:$0xff] }
 0x103   :  { %1347 = vmatprep.subr.bf16.mxu1 %v5229_v12 }
 0x104   :  { %1348 = vmatpush1.bf16.msra.mxu1 %v4011_v44 }
 0x11f   :  { %v2567_v11 = vpop.f32.mrb[8].mxu0 }
 0x120   :  { %v2568_v13 = vpop.f32.mrb[9].mxu0 }
 0x121   :  { %v2569_v16 = vadd.f32 %v2568_v13, %v2567_v11  ;;  %v2570_v20 = vpop.f32.mrb[10].mxu0  ;;  %v4134_v11 = vld [vmem:[%s5102_s2 + $0x4] ss:$12 sps:$4 sm:$0xff]  }
 0x122   :  { %v2571_v55 = vpop.f32.mrb[11].mxu0  ;;  %5230 = vst [vmem:[#allocation45_spill] sm:$0xff] %v4134_v11  ;;  %1603 = vmatprep.subr.bf16.mxu1 %v4134_v11  ;;  %v4146_v11 = vld [vmem:[%s5106_s3 + $0x80] sm:$0xff]  }
 0x123   :  { %v913_v52 = vadd.f32 %v2569_v16, %v873_v10  ;;  %v217_v55 = vsub.s32 0, %v216_v24  ;;  %v221_v10 = vsub.s32 1, %v216_v24 }
 0x125   :  { %v4137_v13 = vrot.slane %v30_v61, %v217_v55  ;;  %v4139_v16 = vrot.slane %v30_v61, %v221_v10  ;;  %v4152_v61 = vld [vmem:[%s5106_s3 + $0x88] sm:$0xff]   ;;  %v2493_v55 = vld [vmem:[%s5104_s0 + $0x18] sm:$0xff] }
 0x126   :  { %v4206_v10 = vcombine.high %v2493_v55, %v2493_v55 }
 0x128   :  { %1349 = vmatprep.mubr.bf16.mxu1 %v4206_v10 }
 0x155   :  { %v831_v20 = vpop.f32.mrb[0].mxu1 }
 0x156   :  { %v2989_v7 = vadd.f32 %v831_v20, %v4137_v13  ;;  %v833_v40 = vpop.f32.mrb[1].mxu1  ;;  %v4208_v20 = vcombine.low %v2493_v55, %v2493_v55  ;;  %v4237_v55 = vld [vmem:[%s5102_s2 + $0x34] ss:$12 sps:$4 sm:$0xff]  }
 0x157   :  { %v2990_v12 = vadd.f32 %v833_v40, %v4139_v16  ;;  %v835_v44 = vpop.f32.mrb[2].mxu1  ;;  %v4161_v40 = vld [vmem:[%s5106_s3 + $0x90] sm:$0xff]   ;;  %5233 = vst [vmem:[#allocation48_spill] sm:$0xff] %v4237_v55 }
 0x158   :  { %v918_v43 = vmax.f32 %v2989_v7, 0.0  ;;  %v836_v14 = vpop.f32.mrb[3].mxu1  ;;  %v4175_v44 = vld [vmem:[%s5106_s3 + $0xa0] sm:$0xff]   ;;  %v4196_v7 = vld [vmem:[%s5106_s3 + $0xb8] sm:$0xff]   ;;  %1350 = vmatmul.mubr.bf16.vlgmr.msra.gmra.mrb[4].mxu1 %v4208_v20 }
 0x159   :  { %v919_v25 = vmax.f32 %v2990_v12, 0.0  ;;  %v4189_v14 = vld [vmem:[%s5106_s3 + $0xb0] sm:$0xff]  }
 0x15a   :  { %v921_v24 = vpack.c.bf16 %v918_v43, %v918_v43  ;;  %v4168_v43 = vld [vmem:[%s5106_s3 + $0x98] sm:$0xff]  }
 0x15b   :  { %v922_v51 = vpack.c.bf16 %v919_v25, %v919_v25  ;;  %v920_v25 = vmax.f32 %v913_v52, 0.0  ;;  %v3193_v52 = vld [vmem:[%s5108_s4] sm:$0xff]  }
 0x15d   :  { %1148 = vmatprep.mubr.bf16.mxu0 %v922_v51  ;;  %v4182_v51 = vld [vmem:[%s5106_s3 + $0xa8] sm:$0xff]   ;;  %v923_v12 = vpack.c.bf16 %v920_v25, %v920_v25 }
 0x15e   :  { %1149 = vmatmul.mubr.bf16.vlgmr.msra.gmra.mrb[12].mxu0 %v921_v24  ;;  %v4218_v24 = vld [vmem:[%s5102_s2] ss:$12 sps:$4 sm:$0xff]   ;;  %v4224_v25 = vld [vmem:[%s5102_s2 + $0x1c] ss:$12 sps:$4 sm:$0xff]  }
 0x15f   :  { %2857 = vmatpush3.bf16.msra.mxu0 %v4146_v11  ;;  %2872 = vmatprep.mubr.msk.bf16.mxu0 %vm3338_vm0, %v5226_v6  ;;  %5231 = vst [vmem:[#allocation46_spill] sm:$0xff] %v4224_v25 }
 0x160   :  { %2858 = vmatprep.subr.bf16.mxu0 %v5226_v6  ;;  %1604 = vmatpush1.bf16.msra.mxu1 %v4218_v24 }
 0x161   :  { %1605 = vmatprep.subr.bf16.mxu1 %v4224_v25  ;;  %v4249_v25 = vld [vmem:[%s5102_s2 + $0x4c] ss:$12 sps:$4 sm:$0xff]  }
 0x162   :  { %5235 = vst [vmem:[#allocation50_spill] sm:$0xff] %v4249_v25 }
 0x163   :  { %2859 = vmatpush3.bf16.msra.mxu0 %v4152_v61 }
 0x164   :  { %2860 = vmatprep.subr.bf16.mxu0 %v5226_v6 }
 0x167   :  { %2861 = vmatpush3.bf16.msra.mxu0 %v4161_v40 }
 0x168   :  { %2862 = vmatprep.subr.bf16.mxu0 %v5226_v6 }
 0x16b   :  { %2863 = vmatpush3.bf16.msra.mxu0 %v4168_v43 }
 0x16c   :  { %2864 = vmatprep.subr.bf16.mxu0 %v5226_v6 }
 0x16f   :  { %2865 = vmatpush3.bf16.msra.mxu0 %v4175_v44 }
 0x170   :  { %2866 = vmatprep.subr.bf16.mxu0 %v5226_v6 }
 0x173   :  { %2867 = vmatpush3.bf16.msra.mxu0 %v4182_v51 }
 0x174   :  { %2868 = vmatprep.subr.bf16.mxu0 %v5226_v6 }
 0x177   :  { %2869 = vmatpush3.bf16.msra.mxu0 %v4189_v14 }
 0x178   :  { %2870 = vmatprep.subr.bf16.mxu0 %v5226_v6 }
 0x17b   :  { %2871 = vmatpush3.bf16.msra.mxu0 %v4196_v7 }
 0x17c   :  { %2876 = vmatprep.subr.bf16.mxu0 %v5226_v6 }
 0x17e   :  { %2873 = vmatmul.mubr.bf16.vlgmr.msra.gmra.mrb[16].mxu0 %v923_v12  ;;  %v4231_v12 = vld [vmem:[%s5102_s2 + $0x18] ss:$12 sps:$4 sm:$0xff]  }
 0x17f   :  { %2880 = vmatprep.mubr.msk.bf16.mxu0 %vm3338_vm0, %v5226_v6  ;;  %2877 = vmatpush3.bf16.msra.mxu0 %v3193_v52  ;;  %5232 = vst [vmem:[#allocation47_spill] sm:$0xff] %v4231_v12  ;;  %v4243_v52 = vld [vmem:[%s5102_s2 + $0x30] ss:$12 sps:$4 sm:$0xff]  }
 0x180   :  { %2878 = vmatprep.subr.bf16.mxu0 %v5226_v6  ;;  %1606 = vmatpush1.bf16.msra.mxu1 %v4231_v12  ;;  %5234 = vst [vmem:[#allocation49_spill] sm:$0xff] %v4243_v52  ;;  %v4255_v12 = vld [vmem:[%s5102_s2 + $0x48] ss:$12 sps:$4 sm:$0xff]  }
 0x181   :  { %1607 = vmatprep.subr.bf16.mxu1 %v4237_v55  ;;  %5236 = vst [vmem:[#allocation51_spill] sm:$0xff] %v4255_v12  ;;  %v4261_v55 = vld [vmem:[%s5102_s2 + $0x64] ss:$12 sps:$4 sm:$0xff]  }
 0x182   :  { %5237 = vst [vmem:[#allocation52_spill] sm:$0xff] %v4261_v55 }
 0x184   :  { %1608 = vmatpush1.bf16.msra.mxu1 %v4243_v52  ;;  %v4267_v52 = vld [vmem:[%s5102_s2 + $0x60] ss:$12 sps:$4 sm:$0xff]  }
 0x185   :  { %1609 = vmatprep.subr.bf16.mxu1 %v4249_v25  ;;  %5238 = vst [vmem:[#allocation53_spill] sm:$0xff] %v4267_v52  ;;  %v4273_v25 = vld [vmem:[%s5102_s2 + $0x7c] ss:$12 sps:$4 sm:$0xff]  }
 0x186   :  { %5239 = vst [vmem:[#allocation54_spill] sm:$0xff] %v4273_v25 }
 0x188   :  { %1610 = vmatpush1.bf16.msra.mxu1 %v4255_v12  ;;  %v4279_v12 = vld [vmem:[%s5102_s2 + $0x78] ss:$12 sps:$4 sm:$0xff]  }
 0x189   :  { %1611 = vmatprep.subr.bf16.mxu1 %v4261_v55  ;;  %5240 = vst [vmem:[#allocation55_spill] sm:$0xff] %v4279_v12  ;;  %v4285_v55 = vld [vmem:[%s5102_s2 + $0x94] ss:$12 sps:$4 sm:$0xff]  }
 0x18a   :  { %5241 = vst [vmem:[#allocation56_spill] sm:$0xff] %v4285_v55 }
 0x18c   :  { %1612 = vmatpush1.bf16.msra.mxu1 %v4267_v52  ;;  %v4291_v52 = vld [vmem:[%s5102_s2 + $0x90] ss:$12 sps:$4 sm:$0xff]  }
 0x18d   :  { %1613 = vmatprep.subr.bf16.mxu1 %v4273_v25  ;;  %5242 = vst [vmem:[#allocation57_spill] sm:$0xff] %v4291_v52  ;;  %v4297_v25 = vld [vmem:[%s5102_s2 + $0xac] ss:$12 sps:$4 sm:$0xff]  }
 0x18e   :  { %5243 = vst [vmem:[#allocation58_spill] sm:$0xff] %v4297_v25 }
 0x190   :  { %1614 = vmatpush1.bf16.msra.mxu1 %v4279_v12  ;;  %v3194_v12 = vld [vmem:[%s5108_s4 + $0x8] sm:$0xff]  }
 0x191   :  { %1615 = vmatprep.subr.bf16.mxu1 %v4285_v55  ;;  %v4306_v55 = vld [vmem:[%s5102_s2 + $0xa8] ss:$12 sps:$4 sm:$0xff]   ;;  %2879 = vmatpush3.bf16.msra.mxu0 %v3194_v12  ;;  %v4360_v12 = vld [vmem:[%s5102_s2 + $0x20] ss:$12 sps:$4 sm:$0xff]  }
 0x194   :  { %1616 = vmatpush1.bf16.msra.mxu1 %v4291_v52  ;;  %v4312_v52 = vld [vmem:[%s5102_s2 + $0xc4] ss:$12 sps:$4 sm:$0xff]  }
 0x195   :  { %1617 = vmatprep.subr.bf16.mxu1 %v4297_v25  ;;  %v4318_v25 = vld [vmem:[%s5102_s2 + $0xc8] ss:$12 sps:$4 sm:$0xff]  }
 0x196   :  { %2607 = vmatprep.subr.bf16.mxu0 %v4318_v25 }
 0x198   :  { %1618 = vmatpush1.bf16.msra.mxu1 %v4306_v55 }
 0x199   :  { %1619 = vmatprep.subr.bf16.mxu1 %v4312_v52 }
 0x19c   :  { %1620 = vmatpush1.bf16.msra.mxu1 %v3516_v28 }
 0x19d   :  { %1621 = vmatprep.subr.bf16.mxu1 %v3525_v30 }
 0x1a0   :  { %1622 = vmatpush1.bf16.msra.mxu1 %v3534_v32 }
 0x1a1   :  { %1623 = vmatprep.subr.bf16.mxu1 %v3543_v34 }
 0x1a4   :  { %1624 = vmatpush1.bf16.msra.mxu1 %v3555_v37 }
 0x1a5   :  { %1625 = vmatprep.subr.bf16.mxu1 %v3561_v38  ;;  %v4340_v38 = vld [vmem:[%s5107_s7 + $0x1] ss:$0 sm:$0xff] }
 0x1a8   :  { %1626 = vmatpush1.bf16.msra.mxu1 %v3578_v41 }
 0x1a9   :  { %1627 = vmatprep.subr.bf16.mxu1 %v3584_v42 }
 0x1ac   :  { %1628 = vmatpush1.bf16.msra.mxu1 %v3602_v45 }
 0x1ad   :  { %1629 = vmatprep.subr.bf16.mxu1 %v3607_v46 }
 0x1b0   :  { %1630 = vmatpush1.bf16.msra.mxu1 %v3625_v49 }
 0x1b1   :  { %1631 = vmatprep.subr.bf16.mxu1 %v3631_v50 }
 0x1b4   :  { %1632 = vmatpush1.bf16.msra.mxu1 %v3649_v53 }
 0x1b5   :  { %1633 = vmatprep.subr.bf16.mxu1 %v3655_v54 }
 0x1b8   :  { %1634 = vmatpush1.bf16.msra.mxu1 %v3675_v58  ;;  %v4347_v58 = vld [vmem:[%s5102_s2 + $0x8] ss:$12 sps:$4 sm:$0xff]  }
 0x1b9   :  { %1644 = vmatprep.subr.bf16.mxu1 %v3681_v59  ;;  %v4354_v59 = vld [vmem:[%s5102_s2 + $0xe0] ss:$12 sps:$4 sm:$0xff]  }
 0x231   :  { %v2589_v28 = vpop.f32.mrb[12].mxu0 }
 0x232   :  { %v2590_v30 = vpop.f32.mrb[13].mxu0 }
 0x233   :  { %v2591_v32 = vadd.f32 %v2590_v30, %v2589_v28  ;;  %v2592_v34 = vpop.f32.mrb[14].mxu0  ;;  %v4366_v28 = vld [vmem:[%s5102_s2 + $0xf8] ss:$12 sps:$4 sm:$0xff]   ;;  %v4378_v30 = vld [vmem:[%s5102_s2 + $0x110] ss:$12 sps:$4 sm:$0xff]  }
 0x234   :  { %v2593_v37 = vpop.f32.mrb[15].mxu0  ;;  %5244 = vst [vmem:[#allocation59_spill] sm:$0xff] %v4378_v30  ;;  %v4390_v34 = vld [vmem:[%s5102_s2 + $0x128] ss:$12 sps:$4 sm:$0xff]  }
 0x235   :  { %v1151_v41 = vadd.f32 %v2591_v32, %v4340_v38  ;;  %v4384_v32 = vld [vmem:[%s5102_s2 + $0x50] ss:$12 sps:$4 sm:$0xff]   ;;  %5246 = vst [vmem:[#allocation61_spill] sm:$0xff] %v4390_v34  ;;  %v5247_v37 = vld [vmem:[#allocation2_spill] sm:$0xff] }
 0x236   :  { %5245 = vst [vmem:[#allocation60_spill] sm:$0xff] %v4384_v32 }
 0x251   :  { %v1190_v42 = vpop.f32.mrb[16].mxu0 }
 0x252   :  { %v1191_v45 = vadd.f32 %v1190_v42, %v1151_v41  ;;  %v2874_v46 = vpop.f32.mrb[17].mxu0  ;;  %v5248_v41 = vld [vmem:[#allocation3_spill] sm:$0xff]  ;;  %v5249_v42 = vld [vmem:[#allocation4_spill] sm:$0xff] }
 0x253   :  { %v1193_v49 = vpop.f32.mrb[18].mxu0  ;;  %v5251_v46 = vld [vmem:[#allocation6_spill] sm:$0xff] }
 0x254   :  { %v1196_v50 = vmax.f32 %v1191_v45, 0.0  ;;  %v2875_v53 = vpop.f32.mrb[19].mxu0  ;;  %v5250_v45 = vld [vmem:[#allocation5_spill] sm:$0xff]  ;;  %v5252_v49 = vld [vmem:[#allocation7_spill] sm:$0xff] }
 0x255   :  { %v5254_v53 = vld [vmem:[#allocation9_spill] sm:$0xff] }
 0x256   :  { %v1197_v54 = vpack.c.bf16 %v1196_v50, %v1196_v50  ;;  %v5253_v50 = vld [vmem:[#allocation8_spill] sm:$0xff] }
 0x258   :  { %2881 = vmatmul.mubr.msk.bf16.vlgmr.msra.gmra.mrb[0].mxu0 %vm1214_vm3, %v1197_v54  ;;  %v5255_v54 = vld [vmem:[#allocation10_spill] sm:$0xff] }
 0x259   :  { %2608 = vmatpush3.bf16.msra.mxu0 %v4347_v58  ;;  %1390 = vmatprep.mubr.bf16.mxu0 %v4090_v9  ;;  %v4372_v9 = vld [vmem:[%s5102_s2 + $0x38] ss:$12 sps:$4 sm:$0xff]  }
 0x25a   :  { %2609 = vmatprep.subr.bf16.mxu0 %v4354_v59 }
 0x25d   :  { %2610 = vmatpush3.bf16.msra.mxu0 %v4360_v12 }
 0x25e   :  { %2611 = vmatprep.subr.bf16.mxu0 %v4366_v28 }
 0x261   :  { %2612 = vmatpush3.bf16.msra.mxu0 %v4372_v9 }
 0x262   :  { %2613 = vmatprep.subr.bf16.mxu0 %v4378_v30 }
 0x265   :  { %2614 = vmatpush3.bf16.msra.mxu0 %v4384_v32  ;;  %v5265_v32 = vld [vmem:[#allocation20_spill] sm:$0xff] }
 0x266   :  { %2615 = vmatprep.subr.bf16.mxu0 %v4390_v34  ;;  %v5264_v34 = vld [vmem:[#allocation19_spill] sm:$0xff] }
 0x269   :  { %2616 = vmatpush3.bf16.msra.mxu0 %v5247_v37  ;;  %v5256_v37 = vld [vmem:[#allocation11_spill] sm:$0xff] }
 0x26a   :  { %2617 = vmatprep.subr.bf16.mxu0 %v5248_v41  ;;  %v5257_v41 = vld [vmem:[#allocation12_spill] sm:$0xff] }
 0x26d   :  { %2618 = vmatpush3.bf16.msra.mxu0 %v5249_v42  ;;  %v5258_v42 = vld [vmem:[#allocation13_spill] sm:$0xff] }
 0x26e   :  { %2619 = vmatprep.subr.bf16.mxu0 %v5250_v45  ;;  %v5259_v45 = vld [vmem:[#allocation14_spill] sm:$0xff] }
 0x271   :  { %2620 = vmatpush3.bf16.msra.mxu0 %v5251_v46  ;;  %v5260_v46 = vld [vmem:[#allocation15_spill] sm:$0xff] }
 0x272   :  { %2621 = vmatprep.subr.bf16.mxu0 %v5252_v49  ;;  %v5261_v49 = vld [vmem:[#allocation16_spill] sm:$0xff] }
 0x275   :  { %2622 = vmatpush3.bf16.msra.mxu0 %v5253_v50  ;;  %v5262_v50 = vld [vmem:[#allocation17_spill] sm:$0xff] }
 0x276   :  { %2629 = vmatprep.subr.bf16.mxu0 %v5254_v53  ;;  %v1351_v53 = vpop.f32.mrb[4].mxu1 }
 0x278   :  { %1391 = vmatmul.mubr.bf16.vlgmr.msra.gmra.mrb[20].mxu0 %v4088_v8  ;;  %v5263_v8 = vld [vmem:[#allocation18_spill] sm:$0xff] }
 0x279   :  { %2630 = vmatpush3.bf16.msra.mxu0 %v5255_v54  ;;  %1430 = vmatprep.mubr.bf16.mxu0 %v4206_v10  ;;  %v1353_v54 = vpop.f32.mrb[5].mxu1 }
 0x27a   :  { %2631 = vmatprep.subr.bf16.mxu0 %v5256_v37  ;;  %v1355_v10 = vpop.f32.mrb[6].mxu1 }
 0x27b   :  { %v1356_v37 = vpop.f32.mrb[7].mxu1  ;;  %v5274_v10 = vld [vmem:[#allocation29_spill] sm:$0xff] }
 0x27c   :  { %v5275_v37 = vld [vmem:[#allocation31_spill] sm:$0xff] }
 0x27d   :  { %2632 = vmatpush3.bf16.msra.mxu0 %v5257_v41  ;;  %v2992_v41 = vadd.f32 %v1353_v54, %v4139_v16  ;;  %v5273_v54 = vld [vmem:[#allocation28_spill] sm:$0xff] }
 0x27e   :  { %2633 = vmatprep.subr.bf16.mxu0 %v5258_v42  ;;  %v5266_v42 = vld [vmem:[#allocation21_spill] sm:$0xff] }
 0x281   :  { %2634 = vmatpush3.bf16.msra.mxu0 %v5259_v45  ;;  %v5267_v45 = vld [vmem:[#allocation22_spill] sm:$0xff] }
 0x282   :  { %2635 = vmatprep.subr.bf16.mxu0 %v5260_v46  ;;  %v1439_v46 = vmax.f32 %v2992_v41, 0.0  ;;  %v5276_v41 = vld [vmem:[#allocation32_spill] sm:$0xff] }
 0x284   :  { %v1442_v30 = vpack.c.bf16 %v1439_v46, %v1439_v46  ;;  %v5279_v46 = vld [vmem:[#allocation36_spill] sm:$0xff] }
 0x285   :  { %2636 = vmatpush3.bf16.msra.mxu0 %v5261_v49  ;;  %v5268_v49 = vld [vmem:[#allocation23_spill] sm:$0xff] }
 0x286   :  { %2637 = vmatprep.subr.bf16.mxu0 %v5262_v50  ;;  %v5269_v50 = vld [vmem:[#allocation24_spill] sm:$0xff] }
 0x289   :  { %2638 = vmatpush3.bf16.msra.mxu0 %v5263_v8  ;;  %v5270_v8 = vld [vmem:[#allocation25_spill] sm:$0xff] }
 0x28a   :  { %2639 = vmatprep.subr.bf16.mxu0 %v5264_v34  ;;  %v5271_v34 = vld [vmem:[#allocation26_spill] sm:$0xff] }
 0x28d   :  { %2640 = vmatpush3.bf16.msra.mxu0 %v5265_v32  ;;  %v5272_v32 = vld [vmem:[#allocation27_spill] sm:$0xff] }
 0x28e   :  { %2641 = vmatprep.subr.bf16.mxu0 %v5266_v42  ;;  %v5277_v42 = vld [vmem:[#allocation34_spill] sm:$0xff] }
 0x291   :  { %2642 = vmatpush3.bf16.msra.mxu0 %v5267_v45  ;;  %v5278_v45 = vld [vmem:[#allocation35_spill] sm:$0xff] }
 0x292   :  { %2643 = vmatprep.subr.bf16.mxu0 %v5268_v49 }
 0x295   :  { %2644 = vmatpush3.bf16.msra.mxu0 %v5269_v50  ;;  %v2502_v50 = vld [vmem:[%s5104_s0 + $0x28] sm:$0xff] }
 0x296   :  { %2651 = vmatprep.subr.bf16.mxu0 %v5270_v8 }
 0x298   :  { %1431 = vmatmul.mubr.bf16.vlgmr.msra.gmra.mrb[24].mxu0 %v4208_v20  ;;  %v2991_v20 = vadd.f32 %v1351_v53, %v4137_v13  ;;  %v2501_v53 = vld [vmem:[%s5104_s0 + $0x20] sm:$0xff] }
 0x299   :  { %2652 = vmatpush3.bf16.msra.mxu0 %v5271_v34  ;;  %1476 = vmatprep.mubr.bf16.mxu0 %v1442_v30  ;;  %v4462_v8 = vcombine.low %v2501_v53, %v2501_v53  ;;  %v4464_v34 = vcombine.high %v2501_v53, %v2501_v53  ;;  %v5301_v53 = vld [vmem:[#allocation57_spill] sm:$0xff] }
 0x29a   :  { %2653 = vmatprep.subr.bf16.mxu0 %v5272_v32  ;;  %v1438_v30 = vmax.f32 %v2991_v20, 0.0  ;;  %v4466_v32 = vcombine.high %v2502_v50, %v2502_v50  ;;  %v5298_v20 = vld [vmem:[#allocation54_spill] sm:$0xff] }
 0x29b   :  { %1635 = vmatprep.mubr.bf16.mxu1 %v4464_v34 }
 0x29c   :  { %v1441_v49 = vpack.c.bf16 %v1438_v30, %v1438_v30  ;;  %1636 = vmatmul.mubr.bf16.vlgmr.msra.gmra.mrb[8].mxu1 %v4462_v8  ;;  %v5299_v30 = vld [vmem:[#allocation55_spill] sm:$0xff] }
 0x29d   :  { %2654 = vmatpush3.bf16.msra.mxu0 %v5273_v54  ;;  %1645 = vmatpush1.bf16.msra.mxu1 %v3700_v62  ;;  %v5280_v62 = vld [vmem:[#allocation30_spill] sm:$0xff]  ;;  %v5296_v54 = vld [vmem:[#allocation52_spill] sm:$0xff] }
 0x29e   :  { %2655 = vmatprep.subr.bf16.mxu0 %v5274_v10  ;;  %1676 = vmatprep.mubr.bf16.mxu1 %v4466_v32  ;;  %v5297_v10 = vld [vmem:[#allocation53_spill] sm:$0xff] }
 0x29f   :  { %1646 = vmatprep.subr.bf16.mxu1 %v3706_v63  ;;  %v5281_v63 = vld [vmem:[#allocation33_spill] sm:$0xff] }
 0x2a1   :  { %2656 = vmatpush3.bf16.msra.mxu0 %v5275_v37  ;;  %1647 = vmatpush1.bf16.msra.mxu1 %v3724_v17  ;;  %v5284_v17 = vld [vmem:[#allocation39_spill] sm:$0xff] }
 0x2a2   :  { %2657 = vmatprep.subr.bf16.mxu0 %v5276_v41  ;;  %1648 = vmatprep.subr.bf16.mxu1 %v3729_v18 }
 0x2a5   :  { %2658 = vmatpush3.bf16.msra.mxu0 %v5277_v42  ;;  %1649 = vmatpush1.bf16.msra.mxu1 %v3747_v22 }
 0x2a6   :  { %2659 = vmatprep.subr.bf16.mxu0 %v5278_v45  ;;  %1650 = vmatprep.subr.bf16.mxu1 %v3753_v23 }
 0x2a9   :  { %2660 = vmatpush3.bf16.msra.mxu0 %v5279_v46  ;;  %1651 = vmatpush1.bf16.msra.mxu1 %v3771_v29  ;;  %v5290_v29 = vld [vmem:[#allocation46_spill] sm:$0xff] }
 0x2aa   :  { %2661 = vmatprep.subr.bf16.mxu0 %v4025_v39  ;;  %1652 = vmatprep.subr.bf16.mxu1 %v3777_v31  ;;  %v5291_v31 = vld [vmem:[#allocation47_spill] sm:$0xff] }
 0x2ad   :  { %2662 = vmatpush3.bf16.msra.mxu0 %v4033_v0  ;;  %1653 = vmatpush1.bf16.msra.mxu1 %v3798_v1  ;;  %v5282_v1 = vld [vmem:[#allocation37_spill] sm:$0xff] }
 0x2ae   :  { %2663 = vmatprep.subr.bf16.mxu0 %v4063_v2  ;;  %1654 = vmatprep.subr.bf16.mxu1 %v3804_v26  ;;  %v5288_v26 = vld [vmem:[#allocation43_spill] sm:$0xff] }
 0x2b1   :  { %2664 = vmatpush3.bf16.msra.mxu0 %v4068_v3  ;;  %1655 = vmatpush1.bf16.msra.mxu1 %v3822_v21  ;;  %v5287_v21 = vld [vmem:[#allocation42_spill] sm:$0xff] }
 0x2b2   :  { %2665 = vmatprep.subr.bf16.mxu0 %v4075_v4  ;;  %1656 = vmatprep.subr.bf16.mxu1 %v3828_v35  ;;  %v5292_v35 = vld [vmem:[#allocation48_spill] sm:$0xff] }
 0x2b5   :  { %2666 = vmatpush3.bf16.msra.mxu0 %v4080_v5  ;;  %1657 = vmatpush1.bf16.msra.mxu1 %v3840_v19  ;;  %v5286_v19 = vld [vmem:[#allocation41_spill] sm:$0xff] }
 0x2b6   :  { %2884 = vmatprep.subr.bf16.mxu0 %v5226_v6  ;;  %1658 = vmatprep.subr.bf16.mxu1 %v3851_v27  ;;  %v5289_v27 = vld [vmem:[#allocation45_spill] sm:$0xff] }
 0x2b8   :  { %1477 = vmatmul.mubr.bf16.vlgmr.msra.gmra.mrb[28].mxu0 %v1441_v49 }
 0x2b9   :  { %2885 = vmatpush3.bf16.msra.mxu0 %v4146_v11  ;;  %2900 = vmatprep.mubr.msk.bf16.mxu0 %vm3338_vm0, %v5226_v6 }
 0x2ba   :  { %2886 = vmatprep.subr.bf16.mxu0 %v5226_v6  ;;  %1659 = vmatpush1.bf16.msra.mxu1 %v3869_v60  ;;  %v5283_v60 = vld [vmem:[#allocation38_spill] sm:$0xff] }
 0x2bb   :  { %1660 = vmatprep.subr.bf16.mxu1 %v3875_v33  ;;  %v5295_v33 = vld [vmem:[#allocation51_spill] sm:$0xff] }
 0x2bd   :  { %2887 = vmatpush3.bf16.msra.mxu0 %v4152_v61 }
 0x2be   :  { %2888 = vmatprep.subr.bf16.mxu0 %v5226_v6  ;;  %1661 = vmatpush1.bf16.msra.mxu1 %v3895_v15  ;;  %v5285_v15 = vld [vmem:[#allocation40_spill] sm:$0xff] }
 0x2bf   :  { %1662 = vmatprep.subr.bf16.mxu1 %v5280_v62  ;;  %v5302_v62 = vld [vmem:[#allocation58_spill] sm:$0xff] }
 0x2c1   :  { %2889 = vmatpush3.bf16.msra.mxu0 %v4161_v40 }
 0x2c2   :  { %2890 = vmatprep.subr.bf16.mxu0 %v5226_v6  ;;  %1663 = vmatpush1.bf16.msra.mxu1 %v5281_v63  ;;  %v5303_v63 = vld [vmem:[#allocation44_spill] sm:$0xff] }
 0x2c3   :  { %1664 = vmatprep.subr.bf16.mxu1 %v3925_v57 }
 0x2c5   :  { %2891 = vmatpush3.bf16.msra.mxu0 %v4168_v43 }
 0x2c6   :  { %2892 = vmatprep.subr.bf16.mxu0 %v5226_v6  ;;  %1665 = vmatpush1.bf16.msra.mxu1 %v3943_v48 }
 0x2c7   :  { %1666 = vmatprep.subr.bf16.mxu1 %v3949_v36  ;;  %v5294_v36 = vld [vmem:[#allocation50_spill] sm:$0xff] }
 0x2c9   :  { %2893 = vmatpush3.bf16.msra.mxu0 %v4175_v44 }
 0x2ca   :  { %2894 = vmatprep.subr.bf16.mxu0 %v5226_v6  ;;  %1667 = vmatpush1.bf16.msra.mxu1 %v3962_v47  ;;  %v4501_v47 = vcombine.low %v2502_v50, %v2502_v50 }
 0x2cb   :  { %1668 = vmatprep.subr.bf16.mxu1 %v3968_v56  ;;  %v5293_v56 = vld [vmem:[#allocation49_spill] sm:$0xff] }
 0x2cd   :  { %2895 = vmatpush3.bf16.msra.mxu0 %v4182_v51 }
 0x2ce   :  { %2896 = vmatprep.subr.bf16.mxu0 %v5226_v6  ;;  %1669 = vmatpush1.bf16.msra.mxu1 %v5282_v1 }
 0x2cf   :  { %1670 = vmatprep.subr.bf16.mxu1 %v5283_v60 }
 0x2d1   :  { %2897 = vmatpush3.bf16.msra.mxu0 %v4189_v14 }
 0x2d2   :  { %2898 = vmatprep.subr.bf16.mxu0 %v5226_v6  ;;  %1671 = vmatpush1.bf16.msra.mxu1 %v5284_v17 }
 0x2d3   :  { %1672 = vmatprep.subr.bf16.mxu1 %v5285_v15 }
 0x2d5   :  { %2899 = vmatpush3.bf16.msra.mxu0 %v4196_v7 }
 0x2d6   :  { %2904 = vmatprep.subr.bf16.mxu0 %v5226_v6  ;;  %1673 = vmatpush1.bf16.msra.mxu1 %v5286_v19 }
 0x2d7   :  { %1674 = vmatprep.subr.bf16.mxu1 %v5287_v21 }
 0x2da   :  { %1675 = vmatpush1.bf16.msra.mxu1 %v5288_v26  ;;  %v3248_v26 = vld [vmem:[%s5102_s2 + $0x10c] ss:$12 sps:$4 sm:$0xff]  }
 0x2db   :  { %1930 = vmatprep.subr.bf16.mxu1 %v5289_v27  ;;  %v3249_v27 = vld [vmem:[%s5102_s2 + $0x108] ss:$12 sps:$4 sm:$0xff]  }
 0x2dd   :  { %1677 = vmatmul.mubr.bf16.vlgmr.msra.gmra.mrb[8].mxu1 %v4501_v47 }
 0x2de   :  { %1931 = vmatpush1.bf16.msra.mxu1 %v4218_v24  ;;  %v5300_v24 = vld [vmem:[#allocation56_spill] sm:$0xff] }
 0x2df   :  { %1932 = vmatprep.subr.bf16.mxu1 %v5290_v29  ;;  %v3250_v29 = vld [vmem:[%s5102_s2 + $0x124] ss:$12 sps:$4 sm:$0xff]  }
 0x2e2   :  { %1933 = vmatpush1.bf16.msra.mxu1 %v5291_v31  ;;  %v3251_v31 = vld [vmem:[%s5102_s2 + $0x120] ss:$12 sps:$4 sm:$0xff]  }
 0x2e3   :  { %1934 = vmatprep.subr.bf16.mxu1 %v5292_v35  ;;  %v3252_v35 = vld [vmem:[%s5102_s2 + $0x13c] ss:$12 sps:$4 sm:$0xff]  }
 0x2e6   :  { %1935 = vmatpush1.bf16.msra.mxu1 %v5293_v56  ;;  %v3253_v56 = vld [vmem:[%s5102_s2 + $0x138] ss:$12 sps:$4 sm:$0xff]  }
 0x2e7   :  { %1936 = vmatprep.subr.bf16.mxu1 %v5294_v36  ;;  %v3254_v36 = vld [vmem:[%s5102_s2 + $0x154] ss:$12 sps:$4 sm:$0xff]  }
 0x2ea   :  { %1937 = vmatpush1.bf16.msra.mxu1 %v5295_v33 }
 0x2eb   :  { %1938 = vmatprep.subr.bf16.mxu1 %v5296_v54  ;;  %v3255_v54 = vld [vmem:[%s5102_s2 + $0x150] ss:$12 sps:$4 sm:$0xff]  }
 0x2ee   :  { %1939 = vmatpush1.bf16.msra.mxu1 %v5297_v10 }
 0x2ef   :  { %1940 = vmatprep.subr.bf16.mxu1 %v5298_v20  ;;  %v3256_v20 = vld [vmem:[%s5102_s2 + $0x16c] ss:$12 sps:$4 sm:$0xff]  }
 0x2f2   :  { %1941 = vmatpush1.bf16.msra.mxu1 %v5299_v30 }
 0x2f3   :  { %1942 = vmatprep.subr.bf16.mxu1 %v5300_v24 }
 0x2f6   :  { %1943 = vmatpush1.bf16.msra.mxu1 %v5301_v53  ;;  %v3257_v53 = vld [vmem:[%s5102_s2 + $0x168] ss:$12 sps:$4 sm:$0xff]  }
 0x2f7   :  { %1944 = vmatprep.subr.bf16.mxu1 %v5302_v62  ;;  %v3200_v62 = vld [vmem:[%s5108_s4 + $0x18] sm:$0xff]  }
 0x2fa   :  { %1945 = vmatpush1.bf16.msra.mxu1 %v4306_v55  ;;  %v3245_v55 = vld [vmem:[%s5102_s2 + $0xd8] ss:$12 sps:$4 sm:$0xff]  }
 0x2fb   :  { %1946 = vmatprep.subr.bf16.mxu1 %v4312_v52  ;;  %v3246_v52 = vld [vmem:[%s5102_s2 + $0xf4] ss:$12 sps:$4 sm:$0xff]  }
 0x34b   :  { %v2623_v18 = vpop.f32.mrb[20].mxu0 }
 0x34c   :  { %v2624_v57 = vpop.f32.mrb[21].mxu0 }
 0x34d   :  { %v2625_v48 = vadd.f32 %v2624_v57, %v2623_v18  ;;  %v2626_v22 = vpop.f32.mrb[22].mxu0  ;;  %v3199_v57 = vld [vmem:[%s5108_s4 + $0x10] sm:$0xff]  }
 0x34e   :  { %v2627_v23 = vpop.f32.mrb[23].mxu0  ;;  %v3243_v22 = vld [vmem:[%s5102_s2 + $0xc0] ss:$12 sps:$4 sm:$0xff]  }
 0x34f   :  { %v1393_v1 = vadd.f32 %v2625_v48, %v5303_v63  ;;  %1947 = vmatpush1.bf16.msra.mxu1 %v3243_v22  ;;  %v3244_v48 = vld [vmem:[%s5102_s2 + $0xdc] ss:$12 sps:$4 sm:$0xff]  }
 0x350   :  { %1948 = vmatprep.subr.bf16.mxu1 %v3244_v48  ;;  %v3247_v23 = vld [vmem:[%s5102_s2 + $0xf0] ss:$12 sps:$4 sm:$0xff]  }
 0x353   :  { %1949 = vmatpush1.bf16.msra.mxu1 %v3245_v55 }
 0x354   :  { %1950 = vmatprep.subr.bf16.mxu1 %v3246_v52 }
 0x357   :  { %1951 = vmatpush1.bf16.msra.mxu1 %v3247_v23  ;;  %v5304_v23 = vld [vmem:[#allocation59_spill] sm:$0xff] }
 0x358   :  { %1952 = vmatprep.subr.bf16.mxu1 %v3248_v26  ;;  %v5305_v26 = vld [vmem:[#allocation60_spill] sm:$0xff] }
 0x35b   :  { %1953 = vmatpush1.bf16.msra.mxu1 %v3249_v27  ;;  %v5306_v27 = vld [vmem:[#allocation61_spill] sm:$0xff] }
 0x35c   :  { %1954 = vmatprep.subr.bf16.mxu1 %v3250_v29  ;;  %v4597_v29 = vld [vmem:[%s5102_s2 + $0x68] ss:$12 sps:$4 sm:$0xff]  }
 0x35f   :  { %1955 = vmatpush1.bf16.msra.mxu1 %v3251_v31  ;;  %v4609_v31 = vld [vmem:[%s5102_s2 + $0x80] ss:$12 sps:$4 sm:$0xff]  }
 0x360   :  { %1956 = vmatprep.subr.bf16.mxu1 %v3252_v35  ;;  %v4615_v35 = vld [vmem:[%s5102_s2 + $0x158] ss:$12 sps:$4 sm:$0xff]  }
 0x363   :  { %1957 = vmatpush1.bf16.msra.mxu1 %v3253_v56  ;;  %v4621_v56 = vld [vmem:[%s5102_s2 + $0x98] ss:$12 sps:$4 sm:$0xff]  }
 0x364   :  { %1958 = vmatprep.subr.bf16.mxu1 %v3254_v36  ;;  %v4627_v36 = vld [vmem:[%s5102_s2 + $0x170] ss:$12 sps:$4 sm:$0xff]  }
 0x367   :  { %1959 = vmatpush1.bf16.msra.mxu1 %v3255_v54  ;;  %v4639_v54 = vld [vmem:[%s5102_s2 + $0x248] ss:$12 sps:$4 sm:$0xff]  }
 0x368   :  { %1960 = vmatprep.subr.bf16.mxu1 %v3256_v20  ;;  %v4653_v20 = vld [vmem:[%s5102_s2 + $0x260] ss:$12 sps:$4 sm:$0xff]  }
 0x36b   :  { %v2645_v49 = vpop.f32.mrb[24].mxu0  ;;  %1961 = vmatpush1.bf16.msra.mxu1 %v3257_v53  ;;  %v4689_v53 = vld [vmem:[%s5102_s2 + $0x2a8] ss:$12 sps:$4 sm:$0xff]  }
 0x36c   :  { %v2646_v50 = vpop.f32.mrb[25].mxu0 }
 0x36d   :  { %v2647_v60 = vadd.f32 %v2646_v50, %v2645_v49  ;;  %v2648_v17 = vpop.f32.mrb[26].mxu0  ;;  %v3258_v50 = vld [vmem:[%s5102_s2 + $0x184] ss:$12 sps:$4 sm:$0xff]  }
 0x36e   :  { %v2649_v15 = vpop.f32.mrb[27].mxu0  ;;  %1971 = vmatprep.subr.bf16.mxu1 %v3258_v50  ;;  %v4695_v50 = vld [vmem:[%s5102_s2 + $0x1e8] ss:$12 sps:$4 sm:$0xff]  }
 0x36f   :  { %v1433_v18 = vadd.f32 %v2647_v60, %v1393_v1 }
 0x371   :  { %v1440_v19 = vmax.f32 %v1433_v18, 0.0 }
 0x373   :  { %v1443_v21 = vpack.c.bf16 %v1440_v19, %v1440_v19 }
 0x375   :  { %2901 = vmatmul.mubr.bf16.vlgmr.msra.gmra.mrb[32].mxu0 %v1443_v21 }
 0x376   :  { %2905 = vmatpush3.bf16.msra.mxu0 %v3199_v57  ;;  %2908 = vmatprep.mubr.msk.bf16.mxu0 %vm3338_vm0, %v5226_v6 }
 0x377   :  { %2906 = vmatprep.subr.bf16.mxu0 %v5226_v6 }
 0x37a   :  { %2907 = vmatpush3.bf16.msra.mxu0 %v3200_v62  ;;  %v4701_v62 = vld [vmem:[%s5102_s2 + $0x2c0] ss:$12 sps:$4 sm:$0xff]  }
 0x37b   :  { %2685 = vmatprep.subr.bf16.mxu0 %v4318_v25 }
 0x38b   :  { %v2667_v33 = vpop.f32.mrb[28].mxu0 }
 0x38c   :  { %v2668_v10 = vpop.f32.mrb[29].mxu0 }
 0x38d   :  { %v2669_v30 = vadd.f32 %v2668_v10, %v2667_v33  ;;  %v2670_v24 = vpop.f32.mrb[30].mxu0  ;;  %v4633_v33 = vld [vmem:[%s5102_s2 + $0xb0] ss:$12 sps:$4 sm:$0xff]   ;;  %v4646_v10 = vld [vmem:[%s5102_s2 + $0x188] ss:$12 sps:$4 sm:$0xff]  }
 0x38e   :  { %v2671_v49 = vpop.f32.mrb[31].mxu0  ;;  %v4677_v24 = vld [vmem:[%s5102_s2 + $0x290] ss:$12 sps:$4 sm:$0xff]  }
 0x38f   :  { %v1479_v18 = vadd.f32 %v2669_v30, %v4340_v38  ;;  %v4665_v30 = vld [vmem:[%s5102_s2 + $0x278] ss:$12 sps:$4 sm:$0xff]   ;;  %v4683_v49 = vld [vmem:[%s5102_s2 + $0x1d0] ss:$12 sps:$4 sm:$0xff]  }
 0x3b0   :  { %v4581_v1 = vpop.f32.mrb[8].mxu1 }
 0x3b1   :  { %v1680_v60 = vpop.f32.mrb[9].mxu1 }
 0x3b2   :  { %v1682_v17 = vpop.f32.mrb[10].mxu1 }
 0x3b3   :  { %v1683_v15 = vpop.f32.mrb[11].mxu1  ;;  %v4707_v17 = vld [vmem:[%s5102_s2 + $0x200] ss:$12 sps:$4 sm:$0xff]  }
 0x3b4   :  { %v2994_v15 = vadd.f32 %v1680_v60, %v4139_v16  ;;  %v4732_v60 = vld [vmem:[%s5102_s2 + $0x230] ss:$12 sps:$4 sm:$0xff]  }
 0x448   :  { %v1518_v19 = vpop.f32.mrb[32].mxu0 }
 0x449   :  { %v1519_v57 = vadd.f32 %v1518_v19, %v1479_v18  ;;  %v2902_v21 = vpop.f32.mrb[33].mxu0  ;;  %v4714_v18 = vld [vmem:[%s5102_s2 + $0x2d8] ss:$12 sps:$4 sm:$0xff]  }
 0x44a   :  { %v1521_v22 = vpop.f32.mrb[34].mxu0  ;;  %v4720_v19 = vld [vmem:[%s5102_s2 + $0x218] ss:$12 sps:$4 sm:$0xff]   ;;  %v4726_v21 = vld [vmem:[%s5102_s2 + $0x2f0] ss:$12 sps:$4 sm:$0xff]  }
 0x44b   :  { %v1524_v48 = vmax.f32 %v1519_v57, 0.0  ;;  %v2903_v55 = vpop.f32.mrb[35].mxu0  ;;  %v1766_v57 = vmax.f32 %v2994_v15, 0.0  ;;  %v4757_v15 = vld [vmem:[%s5106_s3 + $0x8] sm:$0xff]  }
 0x44c   :  { %v4745_v55 = vld [vmem:[%s5106_s3] sm:$0xff]  }
 0x44d   :  { %v1525_v52 = vpack.c.bf16 %v1524_v48, %v1524_v48  ;;  %v1769_v22 = vpack.c.bf16 %v1766_v57, %v1766_v57  ;;  %v4738_v48 = vld [vmem:[%s5106_s3 + $0x40] sm:$0xff]   ;;  %v2993_v57 = vadd.f32 %v4581_v1, %v4137_v13  ;;  %v3300_v1 = vld [vmem:[%s5102_s2 + $0x22c] ss:$12 sps:$4 sm:$0xff]  }
 0x44f   :  { %2909 = vmatmul.mubr.msk.bf16.vlgmr.msra.gmra.mrb[0].mxu0 %vm1214_vm3, %v1525_v52  ;;  %v4751_v52 = vld [vmem:[%s5106_s3 + $0x48] sm:$0xff]  }
 0x450   :  { %2686 = vmatpush3.bf16.msra.mxu0 %v4347_v58  ;;  %1717 = vmatprep.mubr.bf16.mxu0 %v4464_v34  ;;  %v4603_v34 = vld [vmem:[%s5102_s2 + $0x140] ss:$12 sps:$4 sm:$0xff]  }
 0x451   :  { %2687 = vmatprep.subr.bf16.mxu0 %v4354_v59 }
 0x454   :  { %2688 = vmatpush3.bf16.msra.mxu0 %v4360_v12 }
 0x455   :  { %2689 = vmatprep.subr.bf16.mxu0 %v4366_v28 }
 0x458   :  { %2690 = vmatpush3.bf16.msra.mxu0 %v4372_v9 }
 0x459   :  { %2691 = vmatprep.subr.bf16.mxu0 %v5304_v23 }
 0x45c   :  { %2692 = vmatpush3.bf16.msra.mxu0 %v5305_v26 }
 0x45d   :  { %2693 = vmatprep.subr.bf16.mxu0 %v5306_v27 }
 0x460   :  { %2694 = vmatpush3.bf16.msra.mxu0 %v4597_v29 }
 0x461   :  { %2695 = vmatprep.subr.bf16.mxu0 %v4603_v34 }
 0x464   :  { %2696 = vmatpush3.bf16.msra.mxu0 %v4609_v31 }
 0x465   :  { %2697 = vmatprep.subr.bf16.mxu0 %v4615_v35 }
 0x468   :  { %2698 = vmatpush3.bf16.msra.mxu0 %v4621_v56 }
 0x469   :  { %2699 = vmatprep.subr.bf16.mxu0 %v4627_v36 }
 0x46c   :  { %2700 = vmatpush3.bf16.msra.mxu0 %v4633_v33 }
 0x46d   :  { %2707 = vmatprep.subr.bf16.mxu0 %v4639_v54 }
 0x46f   :  { %1718 = vmatmul.mubr.bf16.vlgmr.msra.gmra.mrb[36].mxu0 %v4462_v8  ;;  %v4659_v8 = vld [vmem:[%s5102_s2 + $0x1a0] ss:$12 sps:$4 sm:$0xff]  }
 0x470   :  { %2708 = vmatpush3.bf16.msra.mxu0 %v4646_v10  ;;  %1757 = vmatprep.mubr.bf16.mxu0 %v4466_v32  ;;  %v4671_v32 = vld [vmem:[%s5102_s2 + $0x1b8] ss:$12 sps:$4 sm:$0xff]  }
 0x471   :  { %2709 = vmatprep.subr.bf16.mxu0 %v4653_v20 }
 0x474   :  { %2710 = vmatpush3.bf16.msra.mxu0 %v4659_v8 }
 0x475   :  { %2711 = vmatprep.subr.bf16.mxu0 %v4665_v30 }
 0x478   :  { %2712 = vmatpush3.bf16.msra.mxu0 %v4671_v32 }
 0x479   :  { %2713 = vmatprep.subr.bf16.mxu0 %v4677_v24 }
 0x47c   :  { %2714 = vmatpush3.bf16.msra.mxu0 %v4683_v49 }
 0x47d   :  { %2715 = vmatprep.subr.bf16.mxu0 %v4689_v53 }
 0x480   :  { %2716 = vmatpush3.bf16.msra.mxu0 %v4695_v50 }
 0x481   :  { %2717 = vmatprep.subr.bf16.mxu0 %v4701_v62 }
 0x484   :  { %2718 = vmatpush3.bf16.msra.mxu0 %v4707_v17 }
 0x485   :  { %2719 = vmatprep.subr.bf16.mxu0 %v4714_v18 }
 0x488   :  { %2720 = vmatpush3.bf16.msra.mxu0 %v4720_v19 }
 0x489   :  { %2721 = vmatprep.subr.bf16.mxu0 %v4726_v21 }
 0x48c   :  { %2722 = vmatpush3.bf16.msra.mxu0 %v4732_v60 }
 0x48d   :  { %2729 = vmatprep.subr.bf16.mxu0 %v4738_v48 }
 0x48f   :  { %1758 = vmatmul.mubr.bf16.vlgmr.msra.gmra.mrb[40].mxu0 %v4501_v47  ;;  %v4763_v47 = vld [vmem:[%s5106_s3 + $0x50] sm:$0xff]  }
 0x490   :  { %2730 = vmatpush3.bf16.msra.mxu0 %v4745_v55  ;;  %1803 = vmatprep.mubr.bf16.mxu0 %v1769_v22  ;;  %v1765_v22 = vmax.f32 %v2993_v57, 0.0  ;;  %v3301_v57 = vld [vmem:[%s5102_s2 + $0x228] ss:$12 sps:$4 sm:$0xff]  }
 0x491   :  { %2731 = vmatprep.subr.bf16.mxu0 %v4751_v52 }
 0x494   :  { %2732 = vmatpush3.bf16.msra.mxu0 %v4757_v15 }
 0x495   :  { %2733 = vmatprep.subr.bf16.mxu0 %v4763_v47 }
 0x498   :  { %2734 = vmatpush3.bf16.msra.mxu0 %v5275_v37  ;;  %v1768_v37 = vpack.c.bf16 %v1765_v22, %v1765_v22  ;;  %v3302_v22 = vld [vmem:[%s5102_s2 + $0x244] ss:$12 sps:$4 sm:$0xff]  }
 0x499   :  { %2735 = vmatprep.subr.bf16.mxu0 %v5276_v41  ;;  %v3296_v41 = vld [vmem:[%s5102_s2 + $0x1fc] ss:$12 sps:$4 sm:$0xff]  }
 0x49c   :  { %2736 = vmatpush3.bf16.msra.mxu0 %v5277_v42  ;;  %v3297_v42 = vld [vmem:[%s5102_s2 + $0x1f8] ss:$12 sps:$4 sm:$0xff]  }
 0x49d   :  { %2737 = vmatprep.subr.bf16.mxu0 %v5278_v45  ;;  %v3298_v45 = vld [vmem:[%s5102_s2 + $0x214] ss:$12 sps:$4 sm:$0xff]  }
 0x4a0   :  { %2738 = vmatpush3.bf16.msra.mxu0 %v5279_v46  ;;  %v3299_v46 = vld [vmem:[%s5102_s2 + $0x210] ss:$12 sps:$4 sm:$0xff]  }
 0x4a1   :  { %2739 = vmatprep.subr.bf16.mxu0 %v4025_v39  ;;  %v2510_v39 = vld [vmem:[%s5104_s0 + $0x30] sm:$0xff] }
 0x4a4   :  { %2740 = vmatpush3.bf16.msra.mxu0 %v4033_v0  ;;  %v4804_v0 = vld [vmem:[%s5104_s0 + $0x38] sm:$0xff] }
 0x4a5   :  { %2741 = vmatprep.subr.bf16.mxu0 %v4063_v2  ;;  %v4806_v2 = vcombine.low %v2510_v39, %v2510_v39 }
 0x4a8   :  { %2742 = vmatpush3.bf16.msra.mxu0 %v4068_v3  ;;  %v4808_v3 = vcombine.high %v2510_v39, %v2510_v39  ;;  %v3304_v39 = vld [vmem:[%s5102_s2 + $0x25c] ss:$12 sps:$4 sm:$0xff]  }
 0x4a9   :  { %2743 = vmatprep.subr.bf16.mxu0 %v4075_v4  ;;  %v4812_v4 = vcombine.high %v4804_v0, %v4804_v0 }
 0x4aa   :  { %1962 = vmatprep.mubr.bf16.mxu1 %v4808_v3 }
 0x4ab   :  { %1963 = vmatmul.mubr.bf16.vlgmr.msra.gmra.mrb[12].mxu1 %v4806_v2 }
 0x4ac   :  { %2744 = vmatpush3.bf16.msra.mxu0 %v4080_v5  ;;  %v3287_v5 = vld [vmem:[%s5102_s2 + $0x180] ss:$12 sps:$4 sm:$0xff]   ;;  %2003 = vmatprep.mubr.bf16.mxu1 %v4812_v4 }
 0x4ad   :  { %2912 = vmatprep.subr.bf16.mxu0 %v5226_v6  ;;  %1972 = vmatpush1.bf16.msra.mxu1 %v3287_v5  ;;  %v3305_v5 = vld [vmem:[%s5102_s2 + $0x258] ss:$12 sps:$4 sm:$0xff]  }
 0x4af   :  { %1804 = vmatmul.mubr.bf16.vlgmr.msra.gmra.mrb[44].mxu0 %v1768_v37  ;;  %v3303_v37 = vld [vmem:[%s5102_s2 + $0x240] ss:$12 sps:$4 sm:$0xff]  }
 0x4b0   :  { %2913 = vmatpush3.bf16.msra.mxu0 %v4146_v11  ;;  %2928 = vmatprep.mubr.msk.bf16.mxu0 %vm3338_vm0, %v5226_v6  ;;  %v3288_v11 = vld [vmem:[%s5102_s2 + $0x19c] ss:$12 sps:$4 sm:$0xff]  }
 0x4b1   :  { %2914 = vmatprep.subr.bf16.mxu0 %v5226_v6  ;;  %1973 = vmatprep.subr.bf16.mxu1 %v3288_v11  ;;  %v3306_v11 = vld [vmem:[%s5102_s2 + $0x274] ss:$12 sps:$4 sm:$0xff]  }
 0x4b4   :  { %2915 = vmatpush3.bf16.msra.mxu0 %v4152_v61  ;;  %v3289_v61 = vld [vmem:[%s5102_s2 + $0x198] ss:$12 sps:$4 sm:$0xff]  }
 0x4b5   :  { %2916 = vmatprep.subr.bf16.mxu0 %v5226_v6  ;;  %1974 = vmatpush1.bf16.msra.mxu1 %v3289_v61  ;;  %v3307_v61 = vld [vmem:[%s5102_s2 + $0x270] ss:$12 sps:$4 sm:$0xff]  }
 0x4b8   :  { %2917 = vmatpush3.bf16.msra.mxu0 %v4161_v40  ;;  %v3290_v40 = vld [vmem:[%s5102_s2 + $0x1b4] ss:$12 sps:$4 sm:$0xff]  }
 0x4b9   :  { %2918 = vmatprep.subr.bf16.mxu0 %v5226_v6  ;;  %1975 = vmatprep.subr.bf16.mxu1 %v3290_v40  ;;  %v3308_v40 = vld [vmem:[%s5102_s2 + $0x28c] ss:$12 sps:$4 sm:$0xff]  }
 0x4bc   :  { %2919 = vmatpush3.bf16.msra.mxu0 %v4168_v43  ;;  %v3291_v43 = vld [vmem:[%s5102_s2 + $0x1b0] ss:$12 sps:$4 sm:$0xff]  }
 0x4bd   :  { %2920 = vmatprep.subr.bf16.mxu0 %v5226_v6  ;;  %1976 = vmatpush1.bf16.msra.mxu1 %v3291_v43  ;;  %v3309_v43 = vld [vmem:[%s5102_s2 + $0x288] ss:$12 sps:$4 sm:$0xff]  }
 0x4c0   :  { %2921 = vmatpush3.bf16.msra.mxu0 %v4175_v44  ;;  %v3292_v44 = vld [vmem:[%s5102_s2 + $0x1cc] ss:$12 sps:$4 sm:$0xff]  }
 0x4c1   :  { %2922 = vmatprep.subr.bf16.mxu0 %v5226_v6  ;;  %1977 = vmatprep.subr.bf16.mxu1 %v3292_v44  ;;  %v3310_v44 = vld [vmem:[%s5102_s2 + $0x2a4] ss:$12 sps:$4 sm:$0xff]  }
 0x4c4   :  { %2923 = vmatpush3.bf16.msra.mxu0 %v4182_v51  ;;  %v3293_v51 = vld [vmem:[%s5102_s2 + $0x1c8] ss:$12 sps:$4 sm:$0xff]  }
 0x4c5   :  { %2924 = vmatprep.subr.bf16.mxu0 %v5226_v6  ;;  %1978 = vmatpush1.bf16.msra.mxu1 %v3293_v51  ;;  %v3311_v51 = vld [vmem:[%s5102_s2 + $0x2a0] ss:$12 sps:$4 sm:$0xff]  }
 0x4c8   :  { %2925 = vmatpush3.bf16.msra.mxu0 %v4189_v14  ;;  %v3294_v14 = vld [vmem:[%s5102_s2 + $0x1e4] ss:$12 sps:$4 sm:$0xff]  }
 0x4c9   :  { %2926 = vmatprep.subr.bf16.mxu0 %v5226_v6  ;;  %1979 = vmatprep.subr.bf16.mxu1 %v3294_v14  ;;  %v3312_v14 = vld [vmem:[%s5102_s2 + $0x2bc] ss:$12 sps:$4 sm:$0xff]  }
 0x4cc   :  { %2927 = vmatpush3.bf16.msra.mxu0 %v4196_v7  ;;  %v3295_v7 = vld [vmem:[%s5102_s2 + $0x1e0] ss:$12 sps:$4 sm:$0xff]  }
 0x4cd   :  { %2932 = vmatprep.subr.bf16.mxu0 %v5226_v6  ;;  %1980 = vmatpush1.bf16.msra.mxu1 %v3295_v7  ;;  %v3313_v7 = vld [vmem:[%s5102_s2 + $0x2b8] ss:$12 sps:$4 sm:$0xff]  }
 0x4ce   :  { %1981 = vmatprep.subr.bf16.mxu1 %v3296_v41  ;;  %v3314_v41 = vld [vmem:[%s5102_s2 + $0x2d4] ss:$12 sps:$4 sm:$0xff]  }
 0x4d1   :  { %1982 = vmatpush1.bf16.msra.mxu1 %v3297_v42 }
 0x4d2   :  { %1983 = vmatprep.subr.bf16.mxu1 %v3298_v45  ;;  %v3315_v45 = vld [vmem:[%s5102_s2 + $0x2d0] ss:$12 sps:$4 sm:$0xff]  }
 0x4d5   :  { %1984 = vmatpush1.bf16.msra.mxu1 %v3299_v46 }
 0x4d6   :  { %1985 = vmatprep.subr.bf16.mxu1 %v3300_v1  ;;  %v3316_v1 = vld [vmem:[%s5102_s2 + $0x2ec] ss:$12 sps:$4 sm:$0xff]  }
 0x4d9   :  { %1986 = vmatpush1.bf16.msra.mxu1 %v3301_v57 }
 0x4da   :  { %1987 = vmatprep.subr.bf16.mxu1 %v3302_v22 }
 0x4dd   :  { %1988 = vmatpush1.bf16.msra.mxu1 %v3303_v37 }
 0x4de   :  { %1989 = vmatprep.subr.bf16.mxu1 %v3304_v39  ;;  %v4909_v39 = vcombine.low %v4804_v0, %v4804_v0 }
 0x4e1   :  { %1990 = vmatpush1.bf16.msra.mxu1 %v3305_v5  ;;  %v3317_v5 = vld [vmem:[%s5102_s2 + $0x2e8] ss:$12 sps:$4 sm:$0xff]  }
 0x4e2   :  { %1991 = vmatprep.subr.bf16.mxu1 %v3306_v11 }
 0x4e5   :  { %1992 = vmatpush1.bf16.msra.mxu1 %v3307_v61 }
 0x4e6   :  { %1993 = vmatprep.subr.bf16.mxu1 %v3308_v40 }
 0x4e9   :  { %1994 = vmatpush1.bf16.msra.mxu1 %v3309_v43 }
 0x4ea   :  { %1995 = vmatprep.subr.bf16.mxu1 %v3310_v44 }
 0x4ed   :  { %1996 = vmatpush1.bf16.msra.mxu1 %v3311_v51 }
 0x4ee   :  { %1997 = vmatprep.subr.bf16.mxu1 %v3312_v14 }
 0x4f1   :  { %1998 = vmatpush1.bf16.msra.mxu1 %v3313_v7  ;;  %v3205_v7 = vld [vmem:[%s5108_s4 + $0x20] sm:$0xff]  }
 0x4f2   :  { %1999 = vmatprep.subr.bf16.mxu1 %v3314_v41 }
 0x4f5   :  { %2000 = vmatpush1.bf16.msra.mxu1 %v3315_v45 }
 0x4f6   :  { %2001 = vmatprep.subr.bf16.mxu1 %v3316_v1 }
 0x4f9   :  { %2002 = vmatpush1.bf16.msra.mxu1 %v3317_v5 }
 0x4fa   :  { %2968 = vmatprep.subr.bf16.mxu1 %v5226_v6 }
 0x4fc   :  { %2004 = vmatmul.mubr.bf16.vlgmr.msra.gmra.mrb[12].mxu1 %v4909_v39 }
 0x4fd   :  { %2984 = vmatprep.mubr.msk.bf16.mxu1 %vm3338_vm0, %v5226_v6 }
 0x542   :  { %v2701_v42 = vpop.f32.mrb[36].mxu0 }
 0x543   :  { %v2702_v46 = vpop.f32.mrb[37].mxu0 }
 0x544   :  { %v2703_v57 = vadd.f32 %v2702_v46, %v2701_v42  ;;  %v2704_v22 = vpop.f32.mrb[38].mxu0 }
 0x545   :  { %v2705_v37 = vpop.f32.mrb[39].mxu0  ;;  %v3206_v22 = vld [vmem:[%s5108_s4 + $0x28] sm:$0xff]  }
 0x546   :  { %v1720_v40 = vadd.f32 %v2703_v57, %v5303_v63 }
 0x562   :  { %v2723_v11 = vpop.f32.mrb[40].mxu0 }
 0x563   :  { %v2724_v61 = vpop.f32.mrb[41].mxu0 }
 0x564   :  { %v2725_v43 = vadd.f32 %v2724_v61, %v2723_v11  ;;  %v2726_v44 = vpop.f32.mrb[42].mxu0 }
 0x565   :  { %v2727_v0 = vpop.f32.mrb[43].mxu0 }
 0x566   :  { %v1760_v51 = vadd.f32 %v2725_v43, %v1720_v40 }
 0x568   :  { %v1767_v14 = vmax.f32 %v1760_v51, 0.0 }
 0x56a   :  { %v1770_v41 = vpack.c.bf16 %v1767_v14, %v1767_v14 }
 0x56c   :  { %2929 = vmatmul.mubr.bf16.vlgmr.msra.gmra.mrb[48].mxu0 %v1770_v41 }
 0x56d   :  { %2933 = vmatpush3.bf16.msra.mxu0 %v3205_v7  ;;  %2936 = vmatprep.mubr.msk.bf16.mxu0 %vm3338_vm0, %v5226_v6 }
 0x56e   :  { %2934 = vmatprep.subr.bf16.mxu0 %v5226_v6 }
 0x571   :  { %2935 = vmatpush3.bf16.msra.mxu0 %v3206_v22  ;;  %v3212_v22 = vld [vmem:[%s5109_s6 + $0x18] sm:$0xff]  }
 0x572   :  { %2763 = vmatprep.subr.bf16.mxu0 %v4318_v25 }
 0x582   :  { %v2745_v42 = vpop.f32.mrb[44].mxu0 }
 0x583   :  { %v2746_v45 = vpop.f32.mrb[45].mxu0 }
 0x584   :  { %v2747_v46 = vadd.f32 %v2746_v45, %v2745_v42  ;;  %v2748_v1 = vpop.f32.mrb[46].mxu0  ;;  %v3208_v45 = vld [vmem:[%s5108_s4 + $0x38] sm:$0xff]  }
 0x585   :  { %v2749_v57 = vpop.f32.mrb[47].mxu0  ;;  %v3210_v1 = vld [vmem:[%s5109_s6 + $0x8] sm:$0xff]  }
 0x586   :  { %v1806_v40 = vadd.f32 %v2747_v46, %v4340_v38  ;;  %v3209_v46 = vld [vmem:[%s5109_s6] sm:$0xff]   ;;  %v3211_v57 = vld [vmem:[%s5109_s6 + $0x10] sm:$0xff]  }
 0x587   :  { %2969 = vmatpush3.bf16.msra.mxu1 %v3209_v46 }
 0x588   :  { %2970 = vmatprep.subr.bf16.mxu1 %v5226_v6 }
 0x58b   :  { %2971 = vmatpush3.bf16.msra.mxu1 %v3210_v1 }
 0x58c   :  { %2972 = vmatprep.subr.bf16.mxu1 %v5226_v6 }
 0x58f   :  { %2973 = vmatpush3.bf16.msra.mxu1 %v3211_v57 }
 0x590   :  { %2974 = vmatprep.subr.bf16.mxu1 %v5226_v6 }
 0x593   :  { %2975 = vmatpush3.bf16.msra.mxu1 %v3212_v22 }
 0x594   :  { %2976 = vmatprep.subr.bf16.mxu1 %v5226_v6 }
 0x5cf   :  { %v4929_v37 = vpop.f32.mrb[12].mxu1 }
 0x5d0   :  { %v2007_v5 = vpop.f32.mrb[13].mxu1 }
 0x5d1   :  { %v2009_v11 = vpop.f32.mrb[14].mxu1  ;;  %v2996_v25 = vadd.f32 %v2007_v5, %v4139_v16  ;;  %v3318_v16 = vld [vmem:[%s5106_s3 + $0x10] sm:$0xff]   ;;  %v3214_v5 = vld [vmem:[%s5109_s6 + $0x28] sm:$0xff]  }
 0x5d2   :  { %v2010_v61 = vpop.f32.mrb[15].mxu1 }
 0x63f   :  { %v1845_v43 = vpop.f32.mrb[48].mxu0 }
 0x640   :  { %v1846_v44 = vadd.f32 %v1845_v43, %v1806_v40  ;;  %v2930_v0 = vpop.f32.mrb[49].mxu0 }
 0x641   :  { %v1848_v51 = vpop.f32.mrb[50].mxu0 }
 0x642   :  { %v1851_v14 = vmax.f32 %v1846_v44, 0.0  ;;  %v2931_v7 = vpop.f32.mrb[51].mxu0 }
 0x643   :  { %v3215_v7 = vld [vmem:[%s5109_s6 + $0x30] sm:$0xff]  }
 0x644   :  { %v1852_v41 = vpack.c.bf16 %v1851_v14, %v1851_v14 }
 0x646   :  { %2937 = vmatmul.mubr.msk.bf16.vlgmr.msra.gmra.mrb[0].mxu0 %vm1214_vm3, %v1852_v41  ;;  %v35_v41 = vld [vmem:[%s5107_s7 + $0x2] ss:$0 sm:$0xff] }
 0x647   :  { %2764 = vmatpush3.bf16.msra.mxu0 %v4347_v58  ;;  %2044 = vmatprep.mubr.bf16.mxu0 %v4808_v3  ;;  %v2093_v58 = vmax.f32 %v2996_v25, 0.0 }
 0x648   :  { %2765 = vmatprep.subr.bf16.mxu0 %v4354_v59 }
 0x649   :  { %v2096_v59 = vpack.c.bf16 %v2093_v58, %v2093_v58 }
 0x64b   :  { %2766 = vmatpush3.bf16.msra.mxu0 %v4360_v12  ;;  %v3319_v12 = vld [vmem:[%s5106_s3 + $0x58] sm:$0xff]  }
 0x64c   :  { %2767 = vmatprep.subr.bf16.mxu0 %v4366_v28  ;;  %v3320_v28 = vld [vmem:[%s5106_s3 + $0x18] sm:$0xff]  }
 0x64f   :  { %2768 = vmatpush3.bf16.msra.mxu0 %v4372_v9  ;;  %v3321_v9 = vld [vmem:[%s5106_s3 + $0x60] sm:$0xff]  }
 0x650   :  { %2769 = vmatprep.subr.bf16.mxu0 %v5304_v23  ;;  %v3322_v23 = vld [vmem:[%s5106_s3 + $0x20] sm:$0xff]  }
 0x653   :  { %2770 = vmatpush3.bf16.msra.mxu0 %v5305_v26  ;;  %v3323_v26 = vld [vmem:[%s5106_s3 + $0x68] sm:$0xff]  }
 0x654   :  { %2771 = vmatprep.subr.bf16.mxu0 %v5306_v27  ;;  %v2995_v27 = vadd.f32 %v4929_v37, %v4137_v13  ;;  %v3327_v13 = vld [vmem:[%s5106_s3 + $0x78] sm:$0xff]   ;;  %v3213_v37 = vld [vmem:[%s5109_s6 + $0x20] sm:$0xff]  }
 0x655   :  { %2977 = vmatpush3.bf16.msra.mxu1 %v3213_v37 }
 0x656   :  { %2978 = vmatprep.subr.bf16.mxu1 %v5226_v6 }
 0x657   :  { %2772 = vmatpush3.bf16.msra.mxu0 %v4597_v29  ;;  %v3324_v29 = vld [vmem:[%s5106_s3 + $0x28] sm:$0xff]  }
 0x658   :  { %2773 = vmatprep.subr.bf16.mxu0 %v4603_v34  ;;  %v3325_v34 = vld [vmem:[%s5106_s3 + $0x70] sm:$0xff]  }
 0x659   :  { %2979 = vmatpush3.bf16.msra.mxu1 %v3214_v5 }
 0x65a   :  { %2980 = vmatprep.subr.bf16.mxu1 %v5226_v6 }
 0x65b   :  { %2774 = vmatpush3.bf16.msra.mxu0 %v4609_v31  ;;  %v2092_v31 = vmax.f32 %v2995_v27, 0.0 }
 0x65c   :  { %2775 = vmatprep.subr.bf16.mxu0 %v4615_v35  ;;  %v3326_v35 = vld [vmem:[%s5106_s3 + $0x30] sm:$0xff]  }
 0x65d   :  { %2981 = vmatpush3.bf16.msra.mxu1 %v3215_v7 }
 0x65e   :  { %2982 = vmatprep.subr.bf16.mxu1 %v5226_v6 }
 0x65f   :  { %2776 = vmatpush3.bf16.msra.mxu0 %v4621_v56  ;;  %v2095_v56 = vpack.c.bf16 %v2092_v31, %v2092_v31 }
 0x660   :  { %2777 = vmatprep.subr.bf16.mxu0 %v4627_v36  ;;  %v3328_v36 = vld [vmem:[%s5106_s3 + $0x38] sm:$0xff]  }
 0x663   :  { %2778 = vmatpush3.bf16.msra.mxu0 %v4633_v33  ;;  %v3329_v33 = vld [vmem:[%s5106_s3 + $0x80] sm:$0xff]  }
 0x664   :  { %2785 = vmatprep.subr.bf16.mxu0 %v4639_v54  ;;  %v3330_v54 = vld [vmem:[%s5106_s3 + $0x88] sm:$0xff]  }
 0x666   :  { %2045 = vmatmul.mubr.bf16.vlgmr.msra.gmra.mrb[52].mxu0 %v4806_v2 }
 0x667   :  { %2786 = vmatpush3.bf16.msra.mxu0 %v4646_v10  ;;  %2084 = vmatprep.mubr.bf16.mxu0 %v4812_v4  ;;  %v3331_v10 = vld [vmem:[%s5106_s3 + $0x90] sm:$0xff]  }
 0x668   :  { %2787 = vmatprep.subr.bf16.mxu0 %v4653_v20  ;;  %v3332_v20 = vld [vmem:[%s5106_s3 + $0x98] sm:$0xff]  }
 0x66b   :  { %2788 = vmatpush3.bf16.msra.mxu0 %v4659_v8  ;;  %v3333_v8 = vld [vmem:[%s5106_s3 + $0xa0] sm:$0xff]  }
 0x66c   :  { %2789 = vmatprep.subr.bf16.mxu0 %v4665_v30  ;;  %v3334_v30 = vld [vmem:[%s5106_s3 + $0xa8] sm:$0xff]  }
 0x66f   :  { %2790 = vmatpush3.bf16.msra.mxu0 %v4671_v32  ;;  %v3335_v32 = vld [vmem:[%s5106_s3 + $0xb0] sm:$0xff]  }
 0x670   :  { %2791 = vmatprep.subr.bf16.mxu0 %v4677_v24  ;;  %v3336_v24 = vld [vmem:[%s5106_s3 + $0xb8] sm:$0xff]  }
 0x673   :  { %2792 = vmatpush3.bf16.msra.mxu0 %v4683_v49 }
 0x674   :  { %2793 = vmatprep.subr.bf16.mxu0 %v4689_v53 }
 0x677   :  { %2794 = vmatpush3.bf16.msra.mxu0 %v4695_v50 }
 0x678   :  { %2795 = vmatprep.subr.bf16.mxu0 %v4701_v62 }
 0x67b   :  { %2796 = vmatpush3.bf16.msra.mxu0 %v4707_v17 }
 0x67c   :  { %2797 = vmatprep.subr.bf16.mxu0 %v4714_v18 }
 0x67f   :  { %2798 = vmatpush3.bf16.msra.mxu0 %v4720_v19 }
 0x680   :  { %2799 = vmatprep.subr.bf16.mxu0 %v4726_v21 }
 0x683   :  { %2800 = vmatpush3.bf16.msra.mxu0 %v4732_v60 }
 0x684   :  { %2807 = vmatprep.subr.bf16.mxu0 %v4738_v48 }
 0x686   :  { %2085 = vmatmul.mubr.bf16.vlgmr.msra.gmra.mrb[56].mxu0 %v4909_v39 }
 0x687   :  { %2808 = vmatpush3.bf16.msra.mxu0 %v4745_v55  ;;  %2130 = vmatprep.mubr.bf16.mxu0 %v2096_v59 }
 0x688   :  { %2809 = vmatprep.subr.bf16.mxu0 %v4751_v52 }
 0x68b   :  { %2810 = vmatpush3.bf16.msra.mxu0 %v4757_v15 }
 0x68c   :  { %2811 = vmatprep.subr.bf16.mxu0 %v4763_v47  ;;  %v3207_v47 = vld [vmem:[%s5108_s4 + $0x30] sm:$0xff]  }
 0x68f   :  { %2812 = vmatpush3.bf16.msra.mxu0 %v3318_v16 }
 0x690   :  { %2813 = vmatprep.subr.bf16.mxu0 %v3319_v12 }
 0x693   :  { %2814 = vmatpush3.bf16.msra.mxu0 %v3320_v28 }
 0x694   :  { %2815 = vmatprep.subr.bf16.mxu0 %v3321_v9 }
 0x697   :  { %2816 = vmatpush3.bf16.msra.mxu0 %v3322_v23 }
 0x698   :  { %2817 = vmatprep.subr.bf16.mxu0 %v3323_v26 }
 0x69b   :  { %2818 = vmatpush3.bf16.msra.mxu0 %v3324_v29 }
 0x69c   :  { %2819 = vmatprep.subr.bf16.mxu0 %v3325_v34  ;;  %v2348_v34 = vld [vmem:[%s5107_s7 + $0x4] ss:$0 sm:$0xff] }
 0x69f   :  { %2820 = vmatpush3.bf16.msra.mxu0 %v3326_v35 }
 0x6a0   :  { %2821 = vmatprep.subr.bf16.mxu0 %v3327_v13 }
 0x6a3   :  { %2822 = vmatpush3.bf16.msra.mxu0 %v3328_v36  ;;  %v2352_v36 = vld [vmem:[%s5107_s7 + $0x5] ss:$0 sm:$0xff] }
 0x6a4   :  { %2940 = vmatprep.subr.bf16.mxu0 %v5226_v6 }
 0x6a6   :  { %2131 = vmatmul.mubr.bf16.vlgmr.msra.gmra.mrb[60].mxu0 %v2095_v56  ;;  %v3339_v56 = vmov 0  }
 0x6a7   :  { %2941 = vmatpush3.bf16.msra.mxu0 %v3329_v33  ;;  %2956 = vmatprep.mubr.msk.bf16.mxu0 %vm3338_vm0, %v5226_v6 }
 0x6a8   :  { %2942 = vmatprep.subr.bf16.mxu0 %v5226_v6  ;;  %3032 = vset.pattern.permute.xlu0 %v3339_v56 }
 0x6ab   :  { %2943 = vmatpush3.bf16.msra.mxu0 %v3330_v54 }
 0x6ac   :  { %2944 = vmatprep.subr.bf16.mxu0 %v5226_v6 }
 0x6af   :  { %2945 = vmatpush3.bf16.msra.mxu0 %v3331_v10 }
 0x6b0   :  { %2946 = vmatprep.subr.bf16.mxu0 %v5226_v6 }
 0x6b3   :  { %2947 = vmatpush3.bf16.msra.mxu0 %v3332_v20 }
 0x6b4   :  { %2948 = vmatprep.subr.bf16.mxu0 %v5226_v6 }
 0x6b7   :  { %2949 = vmatpush3.bf16.msra.mxu0 %v3333_v8 }
 0x6b8   :  { %2950 = vmatprep.subr.bf16.mxu0 %v5226_v6 }
 0x6bb   :  { %2951 = vmatpush3.bf16.msra.mxu0 %v3334_v30 }
 0x6bc   :  { %2952 = vmatprep.subr.bf16.mxu0 %v5226_v6 }
 0x6bf   :  { %2953 = vmatpush3.bf16.msra.mxu0 %v3335_v32 }
 0x6c0   :  { %2954 = vmatprep.subr.bf16.mxu0 %v5226_v6 }
 0x6c3   :  { %2955 = vmatpush3.bf16.msra.mxu0 %v3336_v24 }
 0x6c4   :  { %2960 = vmatprep.subr.bf16.mxu0 %v5226_v6 }
 0x739   :  { %v2779_v49 = vpop.f32.mrb[52].mxu0 }
 0x73a   :  { %v2780_v53 = vpop.f32.mrb[53].mxu0 }
 0x73b   :  { %v2781_v50 = vadd.f32 %v2780_v53, %v2779_v49  ;;  %v2782_v62 = vpop.f32.mrb[54].mxu0 }
 0x73c   :  { %v2783_v17 = vpop.f32.mrb[55].mxu0 }
 0x73d   :  { %v2047_v21 = vadd.f32 %v2781_v50, %v5303_v63 }
 0x759   :  { %v2801_v18 = vpop.f32.mrb[56].mxu0 }
 0x75a   :  { %v2802_v19 = vpop.f32.mrb[57].mxu0 }
 0x75b   :  { %v2803_v60 = vadd.f32 %v2802_v19, %v2801_v18  ;;  %v2804_v48 = vpop.f32.mrb[58].mxu0 }
 0x75c   :  { %v2805_v55 = vpop.f32.mrb[59].mxu0 }
 0x75d   :  { %v2087_v52 = vadd.f32 %v2803_v60, %v2047_v21 }
 0x75f   :  { %v2094_v15 = vmax.f32 %v2087_v52, 0.0 }
 0x761   :  { %v2097_v2 = vpack.c.bf16 %v2094_v15, %v2094_v15 }
 0x763   :  { %2957 = vmatmul.mubr.bf16.vlgmr.msra.gmra.mrb[64].mxu0 %v2097_v2 }
 0x764   :  { %2961 = vmatpush3.bf16.msra.mxu0 %v3207_v47  ;;  %2964 = vmatprep.mubr.msk.bf16.mxu0 %vm3338_vm0, %v5226_v6 }
 0x765   :  { %2962 = vmatprep.subr.bf16.mxu0 %v5226_v6  ;;  %v2258_v6 = vld [vmem:[%s5107_s7 + $0x3] ss:$0 sm:$0xff] }
 0x768   :  { %2963 = vmatpush3.bf16.msra.mxu0 %v3208_v45 }
 0x779   :  { %v2823_v3 = vpop.f32.mrb[60].mxu0 }
 0x77a   :  { %v2824_v4 = vpop.f32.mrb[61].mxu0 }
 0x77b   :  { %v2825_v63 = vadd.f32 %v2824_v4, %v2823_v3  ;;  %v2826_v39 = vpop.f32.mrb[62].mxu0 }
 0x77c   :  { %v2827_v42 = vpop.f32.mrb[63].mxu0 }
 0x77d   :  { %v2133_v11 = vadd.f32 %v2825_v63, %v4340_v38  ;;  %v3216_v38 = vld [vmem:[%s5109_s6 + $0x38] sm:$0xff]  }
 0x77e   :  { %2983 = vmatpush3.bf16.msra.mxu1 %v3216_v38 }
 0x836   :  { %v2172_v61 = vpop.f32.mrb[64].mxu0 }
 0x837   :  { %v2173_v40 = vadd.f32 %v2172_v61, %v2133_v11  ;;  %v2958_v43 = vpop.f32.mrb[65].mxu0 }
 0x838   :  { %v2175_v44 = vpop.f32.mrb[66].mxu0 }
 0x839   :  { %v2178_v0 = vmax.f32 %v2173_v40, 0.0  ;;  %v2959_v51 = vpop.f32.mrb[67].mxu0 }
 0x83b   :  { %v2179_v14 = vpack.c.bf16 %v2178_v0, %v2178_v0 }
 0x83d   :  { %2965 = vmatmul.mubr.msk.bf16.vlgmr.msra.gmra.mrb[0].mxu0 %vm1214_vm3, %v2179_v14 }
 0x910   :  { %v2233_v25 = vpop.f32.mrb[0].mxu0 }
 0x911   :  { %v2988_v58 = vadd.f32 %v2233_v25, %v35_v41  ;;  %v2966_v59 = vpop.f32.mrb[1].mxu0 }
 0x912   :  { %v2236_v16 = vpop.f32.mrb[2].mxu0 }
 0x913   :  { %v2240_v12 = vmax.f32 %v2988_v58, 0.0  ;;  %v2967_v28 = vpop.f32.mrb[3].mxu0 }
 0x915   :  { %v2241_v9 = vpack.c.bf16 %v2240_v12, %v2240_v12 }
 0x917   :  { %2985 = vmatmul.mubr.bf16.vlgmr.msra.gmra.mrb[16].mxu1 %v2241_v9 }
 0x9ea   :  { %v2341_v23 = vpop.f32.mrb[16].mxu1 }
 0x9eb   :  { %v2342_v26 = vadd.f32 %v2341_v23, %v2258_v6  ;;  %v2986_v27 = vpop.f32.mrb[17].mxu1 }
 0x9ec   :  { %v2344_v29 = vpop.f32.mrb[18].mxu1 }
 0x9ed   :  { %v2347_v31 = vmax.f32 %v2342_v26, 0.0  ;;  %v2987_v35 = vpop.f32.mrb[19].mxu1 }
 0x9ef   :  { %v2349_v13 = vmul.f32 %v2348_v34, %v2347_v31 }
 0x9f1   :  { %2350 = vadd.xlane.f32.xlu0 %v2349_v13 }
 0xa7e   :  { %v2351_v33 = vpop.xlane.xlu0 %2350 }
 0xa7f   :  { %v2353_v54 = vadd.f32 %v2352_v36, %v2351_v33 }
 0xa81   :  { %2356 = vperm.xlu0 %3032, %v2353_v54  }
 0xb00   :  { %v2357_v10 = vpop.permute.xlu0 %2356 }
 0xb01   :  { %2359 = vst [vmem:[%s5110_s8] sm:$0xff] %v2357_v10 }

</bundles_post_ra>
